<compile_context>
chip_gen: v6e
topology: v6e:2x2x1
jax: 0.10.0
libtpu: 0.0.40
codegen_flags: <defaults>
</compile_context>

<pallas_src>
import functools
import math

import jax
import jax.numpy as jnp
from jax.experimental import pallas as pl
from jax.experimental.pallas import tpu as pltpu


# ----------------------------------------------------------------------------
# Kernel 1: fused "head" -- concept logits, softmax, classifier MLP (tanh),
#           decoder MLP, output softmax.
# ----------------------------------------------------------------------------
def _head_kernel(*refs):
    img_ref, txtT_ref, scale_ref = refs[0], refs[1], refs[2]
    cparams = refs[3:13]       # classifier (w0,b0,...,w4,b4); w: (in,out) bf16, b: (1,out) f32
    dparams = refs[13:23]      # decoder    (w0,b0,...,w4,b4)
    logits_ref, restruct_ref, outsoft_ref = refs[23], refs[24], refs[25]

    def softmax(x, approx):
        m = jnp.max(x, axis=-1, keepdims=True)
        e = jnp.exp(x - m)
        s = jnp.sum(e, axis=-1, keepdims=True)
        if approx:
            return e * pl.reciprocal(s, approx=True)   # EUP, free slot
        return e / s

    # concept_logits_per_image = logit_scale * image_features @ text_features.T
    scale = scale_ref[0, 0]                             # scalar from SMEM
    logits = scale * jnp.dot(img_ref[...].astype(jnp.bfloat16), txtT_ref[...],
                             preferred_element_type=jnp.float32)
    logits_ref[...] = logits

    # classifier( softmax(logits) ): Linear->Tanh x4, final Linear (bf16 MXU, f32 accum)
    h = softmax(logits, approx=True)
    for li in range(5):
        w = cparams[2 * li][...]
        b = cparams[2 * li + 1][...]
        h = jnp.dot(h.astype(jnp.bfloat16), w, preferred_element_type=jnp.float32) + b
        if li < 4:
            h = jnp.tanh(h)
    cls_logits = h                                      # (tb, class_num)

    # decoder(cls_logits): 5 Linears, no activations
    r = cls_logits
    for li in range(5):
        r = jnp.dot(r.astype(jnp.bfloat16), dparams[2 * li][...],
                    preferred_element_type=jnp.float32) + dparams[2 * li + 1][...]
    restruct_ref[...] = r                               # (tb, concept_num)

    # returned probability output: exact division (matches torch more closely)
    outsoft_ref[...] = softmax(cls_logits, approx=False)


def run_head(img_feat, txtT_bf16, logit_scale, cparams, dparams, class_num):
    B, D = img_feat.shape
    C = txtT_bf16.shape[1]
    if B <= 8:
        tile_b = B                                       # single block (can't split sublanes)
    else:
        # >= 2 parallel grid steps so the v7x second TensorCore gets work
        tile_b = min(128, ((-(-B // 2) + 7) // 8) * 8)

    def full_spec(a):
        nd = a.ndim
        return pl.BlockSpec(a.shape, lambda i, _nd=nd: (0,) * _nd)

    weight_args = (*cparams, *dparams)
    in_specs = (
        [pl.BlockSpec((tile_b, D), lambda i: (i, 0)),
         full_spec(txtT_bf16),
         pl.BlockSpec(memory_space=pltpu.MemorySpace.SMEM)]   # logit_scale scalar
        + [full_spec(a) for a in weight_args]
    )
    out_specs = (
        pl.BlockSpec((tile_b, C), lambda i: (i, 0)),
        pl.BlockSpec((tile_b, C), lambda i: (i, 0)),
        pl.BlockSpec((tile_b, class_num), lambda i: (i, 0)),
    )
    out_shape = (
        jax.ShapeDtypeStruct((B, C), jnp.float32),              # concept logits
        jax.ShapeDtypeStruct((B, C), jnp.float32),              # restruct
        jax.ShapeDtypeStruct((B, class_num), jnp.float32),      # output softmax
    )
    return pl.pallas_call(
        _head_kernel,
        out_shape=out_shape,
        grid=(pl.cdiv(B, tile_b),),
        in_specs=in_specs,
        out_specs=out_specs,
        compiler_params=pltpu.CompilerParams(dimension_semantics=("parallel",)),
    )(img_feat, txtT_bf16, logit_scale, *weight_args)


# ----------------------------------------------------------------------------
# Kernel 2: fused unlinear + deconv3 GEMM.
#   X[b, p, c] = relu(logits)[b, c] * uw[p] + ub[p]   (built on the fly, never in HBM)
#   contrib[b, p, :] = X[b, p, :] @ Wmat(Cin, KH*KW*Cout)
# Grid = (B, spatial tiles), both parallel (megacore-shardable).
# ----------------------------------------------------------------------------
def _unlinear_deconv_gemm_kernel(logits_ref, uw_ref, ub_ref, w_ref, o_ref):
    b = pl.program_id(0)
    x = jnp.maximum(logits_ref[pl.ds(b, 1), :], 0.0)         # (1, C) relu(logits) for batch b
    xt = uw_ref[...] * x + ub_ref[...]                       # (ts, C) VPU broadcast
    o_ref[0] = jnp.dot(xt.astype(jnp.bfloat16), w_ref[...],
                       preferred_element_type=jnp.float32)   # (ts, Np)


def run_unlinear_deconv3_gemm(logits, uw, ub, wmat_bf16, dout2):
    B, C = logits.shape
    Np = wmat_bf16.shape[1]
    ts = dout2 if dout2 <= 512 else 512
    return pl.pallas_call(
        _unlinear_deconv_gemm_kernel,
        out_shape=jax.ShapeDtypeStruct((B, dout2, Np), jnp.float32),
        grid=(B, pl.cdiv(dout2, ts)),
        in_specs=[pl.BlockSpec((B, C), lambda b, t: (0, 0)),        # stays resident
                  pl.BlockSpec((ts, 1), lambda b, t: (t, 0)),
                  pl.BlockSpec((ts, 1), lambda b, t: (t, 0)),
                  pl.BlockSpec(wmat_bf16.shape, lambda b, t: (0, 0))],
        out_specs=pl.BlockSpec((1, ts, Np), lambda b, t: (b, t, 0)),
        compiler_params=pltpu.CompilerParams(
            dimension_semantics=("parallel", "parallel")),
    )(logits, uw, ub, wmat_bf16)


# ----------------------------------------------------------------------------
# Kernel 3: tiled GEMM (bf16 operands cast OUTSIDE, f32 accumulation).
#           Compute core of deconv2 / deconv1 (input-driven formulation).
#           K = Cin is only 8-16 -> output-writeback bound; no K grid axis needed.
# ----------------------------------------------------------------------------
def _matmul_kernel(x_ref, w_ref, o_ref):
    o_ref[...] = jnp.dot(x_ref[...], w_ref[...], preferred_element_type=jnp.float32)


def pallas_matmul(x_bf16, w_bf16, tile_m=1024):
    M, K = x_bf16.shape
    N = w_bf16.shape[1]
    tm = M if M <= tile_m else tile_m
    return pl.pallas_call(
        _matmul_kernel,
        out_shape=jax.ShapeDtypeStruct((M, N), jnp.float32),
        grid=(pl.cdiv(M, tm),),
        in_specs=[pl.BlockSpec((tm, K), lambda i: (i, 0)),
                  pl.BlockSpec((K, N), lambda i: (0, 0))],
        out_specs=pl.BlockSpec((tm, N), lambda i: (i, 0)),
        compiler_params=pltpu.CompilerParams(dimension_semantics=("parallel",)),
    )(x_bf16, w_bf16)


# ----------------------------------------------------------------------------
# col2im scatter-add (XLA glue) + bias:
#   y[b, h*s + kh - p, w*s + kw - p, co] += contrib[b, h, w, (kh,kw,co)]
# ----------------------------------------------------------------------------
def col2im_bias(contrib_nhwN, Cout, KH, KW, stride, padding, bias):
    B, H, W, _ = contrib_nhwN.shape
    Hf = (H - 1) * stride + KH
    Wf = (W - 1) * stride + KW
    out = jnp.zeros((B, Hf, Wf, Cout), jnp.float32)
    # TODO(synk): fuse into the Pallas GEMM kernel (VMEM accumulator over the
    #   KH*KW shifts) to kill these read-modify-write passes at real sizes.
    for kh in range(KH):
        for kw in range(KW):
            c0 = (kh * KW + kw) * Cout
            out = out.at[:, kh:kh + (H - 1) * stride + 1:stride,
                            kw:kw + (W - 1) * stride + 1:stride, :].add(
                contrib_nhwN[:, :, :, c0:c0 + Cout])
    out = out[:, padding:Hf - padding, padding:Wf - padding, :]
    return out + bias.reshape(1, 1, 1, Cout)


def deconv_transpose2d(x_nhwc, wmat_bf16, bias, Cout, KH, KW, stride, padding):
    B, H, W, Cin = x_nhwc.shape
    x2d = x_nhwc.reshape(B * H * W, Cin).astype(jnp.bfloat16)   # bf16 cast outside the kernel
    contrib = pallas_matmul(x2d, wmat_bf16).reshape(B, H, W, -1)
    return col2im_bias(contrib, Cout, KH, KW, stride, padding, bias)


# ----------------------------------------------------------------------------
# One-time parameter preparation (hoisted out of the jitted forward).
# ----------------------------------------------------------------------------
def _prep_deconv_weight(wt, pad_threshold=1.35):
    # (Cin, Cout, KH, KW) -> (Cin, KH*KW*Cout), lane-dense pad only when cheap
    Cin, Cout, KH, KW = wt.shape
    N = KH * KW * Cout
    Np = ((N + 127) // 128) * 128
    wmat = jnp.transpose(wt, (0, 2, 3, 1)).reshape(Cin, N)
    if Np != N and Np <= N * pad_threshold:
        wmat = jnp.pad(wmat, ((0, 0), (0, Np - N)))
    return wmat.astype(jnp.bfloat16)


def prepare_params(params, txt_feat):
    bf = lambda lst: [p.astype(jnp.bfloat16) if i % 2 == 0 else p
                      for i, p in enumerate(lst)]
    return {
        "txtT": jnp.transpose(txt_feat).astype(jnp.bfloat16),
        "classifier": bf(params["classifier"]),
        "decoder": bf(params["decoder"]),
        "unlinear_w": params["unlinear_w"],
        "unlinear_b": params["unlinear_b"],
        "deconv3_wmat": _prep_deconv_weight(params["deconv3_w"]),   # 400 -> 512 (pad)
        "deconv3_b": params["deconv3_b"],
        "deconv2_wmat": _prep_deconv_weight(params["deconv2_w"]),   # 200 -> 256 (pad)
        "deconv2_b": params["deconv2_b"],
        "deconv1_wmat": _prep_deconv_weight(params["deconv1_w"]),   # 12 stays 12 (no pad)
        "deconv1_b": params["deconv1_b"],
    }


# ----------------------------------------------------------------------------
# Full forward (training branch, minus the raw biomedclip passthrough outputs)
# ----------------------------------------------------------------------------
def classification_ae_forward(img_feat, logit_scale, prep, dout, class_num):
    B = img_feat.shape[0]
    dout2 = dout * dout

    logits, restruct, output = run_head(
        img_feat, prep["txtT"], logit_scale,
        prep["classifier"], prep["decoder"], class_num)

    # deconv3 with the unlinear broadcast fused into the GEMM (q never hits HBM)
    contrib3 = run_unlinear_deconv3_gemm(
        logits, prep["unlinear_w"], prep["unlinear_b"], prep["deconv3_wmat"], dout2)
    q = col2im_bias(contrib3.reshape(B, dout, dout, -1),
                    Cout=16, KH=5, KW=5, stride=2, padding=0, bias=prep["deconv3_b"])
    q = deconv_transpose2d(q, prep["deconv2_wmat"], prep["deconv2_b"],
                           Cout=8, KH=5, KW=5, stride=1, padding=0)
    q = deconv_transpose2d(q, prep["deconv1_wmat"], prep["deconv1_b"],
                           Cout=3, KH=2, KW=2, stride=2, padding=1)
    # Module boundary is NCHW (PyTorch); internal path stays NHWC, transpose once.
    decoded_concept = jnp.transpose(q, (0, 3, 1, 2))

    return decoded_concept, logits, restruct, output


# ----------------------------------------------------------------------------
# Deterministic parameter construction (synthetic, shapes per module __init__)
# ----------------------------------------------------------------------------
def make_params(key, concept_num, class_num, dout):
    dout2 = dout * dout
    ks = iter(jax.random.split(key, 64))

    def init(shape, scale=0.1):
        return scale * jax.random.normal(next(ks), shape, dtype=jnp.float32)

    cls_dims = [concept_num, 128, 64, 32, 16, class_num]
    dec_dims = [class_num, 16, 32, 64, 128, concept_num]
    classifier, decoder = [], []
    for i in range(5):
        classifier += [init((cls_dims[i], cls_dims[i + 1])),
                       init((1, cls_dims[i + 1]), 0.01)]
    for i in range(5):
        decoder += [init((dec_dims[i], dec_dims[i + 1])),
                    init((1, dec_dims[i + 1]), 0.01)]

    return {
        "classifier": classifier,
        "decoder": decoder,
        # nn.Linear(1, dout^2): weight (dout^2, 1), bias (dout^2,) kept as (dout^2, 1)
        "unlinear_w": init((dout2, 1)),
        "unlinear_b": init((dout2, 1), 0.01),
        "deconv3_w": init((concept_num, 16, 5, 5)), "deconv3_b": init((16,), 0.01),
        "deconv2_w": init((16, 8, 5, 5)),           "deconv2_b": init((8,), 0.01),
        "deconv1_w": init((8, 3, 2, 2)),            "deconv1_b": init((3,), 0.01),
    }


if __name__ == "__main__":
    B, D, CONCEPT, NCLASS, IMG = 2, 64, 8, 4, 32          # small stand-ins (512->64, 224->32)
    dout = int(math.sqrt(IMG * IMG) // 4 - 3 * (5 - 1) // 4)   # same formula as the module

    key = jax.random.PRNGKey(0)
    k_img, k_txt, k_par = jax.random.split(key, 3)

    # biomedclip outputs (L2-normalized features), taken as inputs
    img_feat = jax.random.normal(k_img, (B, D), dtype=jnp.float32)
    txt_feat = jax.random.normal(k_txt, (CONCEPT, D), dtype=jnp.float32)
    img_feat = img_feat / jnp.linalg.norm(img_feat, axis=-1, keepdims=True)
    txt_feat = txt_feat / jnp.linalg.norm(txt_feat, axis=-1, keepdims=True)
    logit_scale = jnp.full((1, 1), 10.0, dtype=jnp.float32)

    params = make_params(k_par, CONCEPT, NCLASS, dout)
    prep = prepare_params(params, txt_feat)               # one-time weight prep (outside jit)

    fwd = jax.jit(functools.partial(classification_ae_forward, dout=dout, class_num=NCLASS))
    decoded, concept_logits, restruct, output = fwd(img_feat, logit_scale, prep)
    jax.block_until_ready((decoded, concept_logits, restruct, output))

    assert decoded.shape == (B, 3, IMG, IMG)
    assert concept_logits.shape == (B, CONCEPT)
    assert restruct.shape == (B, CONCEPT)
    assert output.shape == (B, NCLASS)
    print("KERNEL_OK")
</pallas_src>

<mosaic_0001>
module attributes {stable_mosaic.version = 11 : i64} {
  func.func @_unlinear_deconv_gemm_kernel(%arg0: i32, %arg1: i32, %arg2: memref<2x8xf32, #tpu.memory_space<vmem>>, %arg3: memref<25x1xf32, #tpu.memory_space<vmem>>, %arg4: memref<25x1xf32, #tpu.memory_space<vmem>>, %arg5: memref<8x512xbf16, #tpu.memory_space<vmem>>, %arg6: memref<1x25x512xf32, #tpu.memory_space<vmem>>) attributes {dimension_semantics = [#tpu.dimension_semantics<parallel>, #tpu.dimension_semantics<parallel>], iteration_bounds = array<i64: 2, 1>, scalar_prefetch = 0 : i64, scratch_operands = 0 : i64, tpu.core_type = #tpu.core_type<tc>, window_params = [{pipeline_mode = #tpu.pipeline_mode<synchronous>, transform_indices = @transform_0, window_bounds = array<i64: 2, 8>}, {transform_indices = @transform_1, window_bounds = array<i64: 25, 1>}, {transform_indices = @transform_2, window_bounds = array<i64: 25, 1>}, {pipeline_mode = #tpu.pipeline_mode<synchronous>, transform_indices = @transform_3, window_bounds = array<i64: 8, 512>}, {transform_indices = @transform_4, window_bounds = array<i64: 1, 25, 512>}]} {
    %0 = arith.index_cast %arg0 : i32 to index
    %c0 = arith.constant 0 : index
    %1 = vector.load %arg2[%0, %c0] : memref<2x8xf32, #tpu.memory_space<vmem>>, vector<1x8xf32>
    %cst = arith.constant 0.000000e+00 : f32
    %2 = vector.broadcast %cst : f32 to vector<1x8xf32>
    %3 = arith.maximumf %1, %2 : vector<1x8xf32>
    %c0_0 = arith.constant 0 : index
    %c0_1 = arith.constant 0 : index
    %4 = vector.load %arg3[%c0_0, %c0_1] : memref<25x1xf32, #tpu.memory_space<vmem>>, vector<25x1xf32>
    %5 = vector.broadcast %4 : vector<25x1xf32> to vector<25x8xf32>
    %6 = vector.broadcast %3 : vector<1x8xf32> to vector<25x8xf32>
    %7 = arith.mulf %5, %6 : vector<25x8xf32>
    %c0_2 = arith.constant 0 : index
    %c0_3 = arith.constant 0 : index
    %8 = vector.load %arg4[%c0_2, %c0_3] : memref<25x1xf32, #tpu.memory_space<vmem>>, vector<25x1xf32>
    %9 = vector.broadcast %8 : vector<25x1xf32> to vector<25x8xf32>
    %10 = arith.addf %7, %9 : vector<25x8xf32>
    %11 = arith.truncf %10 : vector<25x8xf32> to vector<25x8xbf16>
    %c0_4 = arith.constant 0 : index
    %c0_5 = arith.constant 0 : index
    %12 = vector.load %arg5[%c0_4, %c0_5] : memref<8x512xbf16, #tpu.memory_space<vmem>>, vector<8x512xbf16>
    %cst_6 = arith.constant dense<0.000000e+00> : vector<25x512xf32>
    %13 = tpu.matmul %11, %12, %cst_6 {dimension_numbers = #tpu.dot_dimension_numbers<[1], [0], [0], [1], [0, 0, 1, 1], [], []>} : vector<25x8xbf16>, vector<8x512xbf16>, vector<25x512xf32> -> vector<25x512xf32>
    %c0_7 = arith.constant 0 : index
    %c0_8 = arith.constant 0 : index
    %c0_9 = arith.constant 0 : index
    %14 = vector.load %arg6[%c0_7, %c0_8, %c0_9] : memref<1x25x512xf32, #tpu.memory_space<vmem>>, vector<1x25x512xf32>
    %15 = vector.shape_cast %14 : vector<1x25x512xf32> to vector<25x512xf32>
    %16 = vector.shape_cast %13 : vector<25x512xf32> to vector<1x25x512xf32>
    tpu.vector_store %arg6[%c0_7, %c0_8, %c0_9], %16 {strides = array<i32>} : memref<1x25x512xf32, #tpu.memory_space<vmem>>, vector<1x25x512xf32>,
    return
  }
  func.func @transform_0(%arg0: i32, %arg1: i32) -> (i32, i32) {
    %c0_i32 = arith.constant 0 : i32
    %c0_i32_0 = arith.constant 0 : i32
    %c0_i32_1 = arith.constant 0 : i32
    return %c0_i32, %c0_i32_0 : i32, i32
  }
  func.func @transform_1(%arg0: i32, %arg1: i32) -> (i32, i32) {
    %c0_i32 = arith.constant 0 : i32
    %c0_i32_0 = arith.constant 0 : i32
    return %arg1, %c0_i32 : i32, i32
  }
  func.func @transform_2(%arg0: i32, %arg1: i32) -> (i32, i32) {
    %c0_i32 = arith.constant 0 : i32
    %c0_i32_0 = arith.constant 0 : i32
    return %arg1, %c0_i32 : i32, i32
  }
  func.func @transform_3(%arg0: i32, %arg1: i32) -> (i32, i32) {
    %c0_i32 = arith.constant 0 : i32
    %c0_i32_0 = arith.constant 0 : i32
    %c0_i32_1 = arith.constant 0 : i32
    return %c0_i32, %c0_i32_0 : i32, i32
  }
  func.func @transform_4(%arg0: i32, %arg1: i32) -> (i32, i32, i32) {
    %c0_i32 = arith.constant 0 : i32
    %c0_i32_0 = arith.constant 0 : i32
    return %arg0, %arg1, %c0_i32 : i32, i32, i32
  }
}

module attributes {stable_mosaic.version = 11 : i64} {
  func.func @_head_kernel(%arg0: i32, %arg1: memref<2x64xf32, #tpu.memory_space<vmem>>, %arg2: memref<64x8xbf16, #tpu.memory_space<vmem>>, %arg3: memref<1x1xf32, #tpu.memory_space<smem>>, %arg4: memref<8x128xbf16, #tpu.memory_space<vmem>>, %arg5: memref<1x128xf32, #tpu.memory_space<vmem>>, %arg6: memref<128x64xbf16, #tpu.memory_space<vmem>>, %arg7: memref<1x64xf32, #tpu.memory_space<vmem>>, %arg8: memref<64x32xbf16, #tpu.memory_space<vmem>>, %arg9: memref<1x32xf32, #tpu.memory_space<vmem>>, %arg10: memref<32x16xbf16, #tpu.memory_space<vmem>>, %arg11: memref<1x16xf32, #tpu.memory_space<vmem>>, %arg12: memref<16x4xbf16, #tpu.memory_space<vmem>>, %arg13: memref<1x4xf32, #tpu.memory_space<vmem>>, %arg14: memref<4x16xbf16, #tpu.memory_space<vmem>>, %arg15: memref<1x16xf32, #tpu.memory_space<vmem>>, %arg16: memref<16x32xbf16, #tpu.memory_space<vmem>>, %arg17: memref<1x32xf32, #tpu.memory_space<vmem>>, %arg18: memref<32x64xbf16, #tpu.memory_space<vmem>>, %arg19: memref<1x64xf32, #tpu.memory_space<vmem>>, %arg20: memref<64x128xbf16, #tpu.memory_space<vmem>>, %arg21: memref<1x128xf32, #tpu.memory_space<vmem>>, %arg22: memref<128x8xbf16, #tpu.memory_space<vmem>>, %arg23: memref<1x8xf32, #tpu.memory_space<vmem>>, %arg24: memref<2x8xf32, #tpu.memory_space<vmem>>, %arg25: memref<2x8xf32, #tpu.memory_space<vmem>>, %arg26: memref<2x4xf32, #tpu.memory_space<vmem>>) attributes {dimension_semantics = [#tpu.dimension_semantics<parallel>], iteration_bounds = array<i64: 1>, scalar_prefetch = 0 : i64, scratch_operands = 0 : i64, tpu.core_type = #tpu.core_type<tc>, window_params = [{transform_indices = @transform_0, window_bounds = array<i64: 2, 64>}, {pipeline_mode = #tpu.pipeline_mode<synchronous>, transform_indices = @transform_1, window_bounds = array<i64: 64, 8>}, {transform_indices = @transform_2, window_bounds = array<i64: 1, 1>}, {pipeline_mode = #tpu.pipeline_mode<synchronous>, transform_indices = @transform_3, window_bounds = array<i64: 8, 128>}, {pipeline_mode = #tpu.pipeline_mode<synchronous>, transform_indices = @transform_4, window_bounds = array<i64: 1, 128>}, {pipeline_mode = #tpu.pipeline_mode<synchronous>, transform_indices = @transform_5, window_bounds = array<i64: 128, 64>}, {pipeline_mode = #tpu.pipeline_mode<synchronous>, transform_indices = @transform_6, window_bounds = array<i64: 1, 64>}, {pipeline_mode = #tpu.pipeline_mode<synchronous>, transform_indices = @transform_7, window_bounds = array<i64: 64, 32>}, {pipeline_mode = #tpu.pipeline_mode<synchronous>, transform_indices = @transform_8, window_bounds = array<i64: 1, 32>}, {pipeline_mode = #tpu.pipeline_mode<synchronous>, transform_indices = @transform_9, window_bounds = array<i64: 32, 16>}, {pipeline_mode = #tpu.pipeline_mode<synchronous>, transform_indices = @transform_10, window_bounds = array<i64: 1, 16>}, {pipeline_mode = #tpu.pipeline_mode<synchronous>, transform_indices = @transform_11, window_bounds = array<i64: 16, 4>}, {pipeline_mode = #tpu.pipeline_mode<synchronous>, transform_indices = @transform_12, window_bounds = array<i64: 1, 4>}, {pipeline_mode = #tpu.pipeline_mode<synchronous>, transform_indices = @transform_13, window_bounds = array<i64: 4, 16>}, {pipeline_mode = #tpu.pipeline_mode<synchronous>, transform_indices = @transform_14, window_bounds = array<i64: 1, 16>}, {pipeline_mode = #tpu.pipeline_mode<synchronous>, transform_indices = @transform_15, window_bounds = array<i64: 16, 32>}, {pipeline_mode = #tpu.pipeline_mode<synchronous>, transform_indices = @transform_16, window_bounds = array<i64: 1, 32>}, {pipeline_mode = #tpu.pipeline_mode<synchronous>, transform_indices = @transform_17, window_bounds = array<i64: 32, 64>}, {pipeline_mode = #tpu.pipeline_mode<synchronous>, transform_indices = @transform_18, window_bounds = array<i64: 1, 64>}, {pipeline_mode = #tpu.pipeline_mode<synchronous>, transform_indices = @transform_19, window_bounds = array<i64: 64, 128>}, {pipeline_mode = #tpu.pipeline_mode<synchronous>, transform_indices = @transform_20, window_bounds = array<i64: 1, 128>}, {pipeline_mode = #tpu.pipeline_mode<synchronous>, transform_indices = @transform_21, window_bounds = array<i64: 128, 8>}, {pipeline_mode = #tpu.pipeline_mode<synchronous>, transform_indices = @transform_22, window_bounds = array<i64: 1, 8>}, {transform_indices = @transform_23, window_bounds = array<i64: 2, 8>}, {transform_indices = @transform_24, window_bounds = array<i64: 2, 8>}, {transform_indices = @transform_25, window_bounds = array<i64: 2, 4>}]} {
    %c0 = arith.constant 0 : index
    %c0_0 = arith.constant 0 : index
    %0 = memref.load %arg3[%c0, %c0_0] : memref<1x1xf32, #tpu.memory_space<smem>>
    %c0_1 = arith.constant 0 : index
    %c0_2 = arith.constant 0 : index
    %1 = vector.load %arg1[%c0_1, %c0_2] : memref<2x64xf32, #tpu.memory_space<vmem>>, vector<2x64xf32>
    %2 = arith.truncf %1 : vector<2x64xf32> to vector<2x64xbf16>
    %c0_3 = arith.constant 0 : index
    %c0_4 = arith.constant 0 : index
    %3 = vector.load %arg2[%c0_3, %c0_4] : memref<64x8xbf16, #tpu.memory_space<vmem>>, vector<64x8xbf16>
    %cst = arith.constant dense<0.000000e+00> : vector<2x8xf32>
    %4 = tpu.matmul %2, %3, %cst {dimension_numbers = #tpu.dot_dimension_numbers<[1], [0], [0], [1], [0, 0, 1, 1], [], []>} : vector<2x64xbf16>, vector<64x8xbf16>, vector<2x8xf32> -> vector<2x8xf32>
    %5 = vector.broadcast %0 : f32 to vector<2x8xf32>
    %6 = arith.mulf %5, %4 : vector<2x8xf32>
    %c0_5 = arith.constant 0 : index
    %c0_6 = arith.constant 0 : index
    %7 = vector.load %arg24[%c0_5, %c0_6] : memref<2x8xf32, #tpu.memory_space<vmem>>, vector<2x8xf32>
    tpu.vector_store %arg24[%c0_5, %c0_6], %6 {strides = array<i32>} : memref<2x8xf32, #tpu.memory_space<vmem>>, vector<2x8xf32>,
    %cst_7 = arith.constant dense<0xFF800000> : vector<2xf32>
    %8 = vector.multi_reduction <maximumf>, %6, %cst_7 [1] : vector<2x8xf32> to vector<2xf32>
    %9 = vector.shape_cast %8 : vector<2xf32> to vector<2x1xf32>
    %10 = vector.broadcast %9 : vector<2x1xf32> to vector<2x8xf32>
    %11 = arith.subf %6, %10 : vector<2x8xf32>
    %12 = math.exp %11 : vector<2x8xf32>
    %cst_8 = arith.constant dense<0.000000e+00> : vector<2xf32>
    %13 = vector.multi_reduction <add>, %12, %cst_8 [1] : vector<2x8xf32> to vector<2xf32>
    %14 = vector.shape_cast %13 : vector<2xf32> to vector<2x1xf32>
    %15 = tpu.reciprocal %14 {approx = true} : vector<2x1xf32> -> vector<2x1xf32>
    %16 = vector.broadcast %15 : vector<2x1xf32> to vector<2x8xf32>
    %17 = arith.mulf %12, %16 : vector<2x8xf32>
    %c0_9 = arith.constant 0 : index
    %c0_10 = arith.constant 0 : index
    %18 = vector.load %arg4[%c0_9, %c0_10] : memref<8x128xbf16, #tpu.memory_space<vmem>>, vector<8x128xbf16>
    %c0_11 = arith.constant 0 : index
    %c0_12 = arith.constant 0 : index
    %19 = vector.load %arg5[%c0_11, %c0_12] : memref<1x128xf32, #tpu.memory_space<vmem>>, vector<1x128xf32>
    %20 = arith.truncf %17 : vector<2x8xf32> to vector<2x8xbf16>
    %cst_13 = arith.constant dense<0.000000e+00> : vector<2x128xf32>
    %21 = tpu.matmul %20, %18, %cst_13 {dimension_numbers = #tpu.dot_dimension_numbers<[1], [0], [0], [1], [0, 0, 1, 1], [], []>} : vector<2x8xbf16>, vector<8x128xbf16>, vector<2x128xf32> -> vector<2x128xf32>
    %22 = vector.broadcast %19 : vector<1x128xf32> to vector<2x128xf32>
    %23 = arith.addf %21, %22 : vector<2x128xf32>
    %24 = math.tanh %23 : vector<2x128xf32>
    %c0_14 = arith.constant 0 : index
    %c0_15 = arith.constant 0 : index
    %25 = vector.load %arg6[%c0_14, %c0_15] : memref<128x64xbf16, #tpu.memory_space<vmem>>, vector<128x64xbf16>
    %c0_16 = arith.constant 0 : index
    %c0_17 = arith.constant 0 : index
    %26 = vector.load %arg7[%c0_16, %c0_17] : memref<1x64xf32, #tpu.memory_space<vmem>>, vector<1x64xf32>
    %27 = arith.truncf %24 : vector<2x128xf32> to vector<2x128xbf16>
    %cst_18 = arith.constant dense<0.000000e+00> : vector<2x64xf32>
    %28 = tpu.matmul %27, %25, %cst_18 {dimension_numbers = #tpu.dot_dimension_numbers<[1], [0], [0], [1], [0, 0, 1, 1], [], []>} : vector<2x128xbf16>, vector<128x64xbf16>, vector<2x64xf32> -> vector<2x64xf32>
    %29 = vector.broadcast %26 : vector<1x64xf32> to vector<2x64xf32>
    %30 = arith.addf %28, %29 : vector<2x64xf32>
    %31 = math.tanh %30 : vector<2x64xf32>
    %c0_19 = arith.constant 0 : index
    %c0_20 = arith.constant 0 : index
    %32 = vector.load %arg8[%c0_19, %c0_20] : memref<64x32xbf16, #tpu.memory_space<vmem>>, vector<64x32xbf16>
    %c0_21 = arith.constant 0 : index
    %c0_22 = arith.constant 0 : index
    %33 = vector.load %arg9[%c0_21, %c0_22] : memref<1x32xf32, #tpu.memory_space<vmem>>, vector<1x32xf32>
    %34 = arith.truncf %31 : vector<2x64xf32> to vector<2x64xbf16>
    %cst_23 = arith.constant dense<0.000000e+00> : vector<2x32xf32>
    %35 = tpu.matmul %34, %32, %cst_23 {dimension_numbers = #tpu.dot_dimension_numbers<[1], [0], [0], [1], [0, 0, 1, 1], [], []>} : vector<2x64xbf16>, vector<64x32xbf16>, vector<2x32xf32> -> vector<2x32xf32>
    %36 = vector.broadcast %33 : vector<1x32xf32> to vector<2x32xf32>
    %37 = arith.addf %35, %36 : vector<2x32xf32>
    %38 = math.tanh %37 : vector<2x32xf32>
    %c0_24 = arith.constant 0 : index
    %c0_25 = arith.constant 0 : index
    %39 = vector.load %arg10[%c0_24, %c0_25] : memref<32x16xbf16, #tpu.memory_space<vmem>>, vector<32x16xbf16>
    %c0_26 = arith.constant 0 : index
    %c0_27 = arith.constant 0 : index
    %40 = vector.load %arg11[%c0_26, %c0_27] : memref<1x16xf32, #tpu.memory_space<vmem>>, vector<1x16xf32>
    %41 = arith.truncf %38 : vector<2x32xf32> to vector<2x32xbf16>
    %cst_28 = arith.constant dense<0.000000e+00> : vector<2x16xf32>
    %42 = tpu.matmul %41, %39, %cst_28 {dimension_numbers = #tpu.dot_dimension_numbers<[1], [0], [0], [1], [0, 0, 1, 1], [], []>} : vector<2x32xbf16>, vector<32x16xbf16>, vector<2x16xf32> -> vector<2x16xf32>
    %43 = vector.broadcast %40 : vector<1x16xf32> to vector<2x16xf32>
    %44 = arith.addf %42, %43 : vector<2x16xf32>
    %45 = math.tanh %44 : vector<2x16xf32>
    %c0_29 = arith.constant 0 : index
    %c0_30 = arith.constant 0 : index
    %46 = vector.load %arg12[%c0_29, %c0_30] : memref<16x4xbf16, #tpu.memory_space<vmem>>, vector<16x4xbf16>
    %c0_31 = arith.constant 0 : index
    %c0_32 = arith.constant 0 : index
    %47 = vector.load %arg13[%c0_31, %c0_32] : memref<1x4xf32, #tpu.memory_space<vmem>>, vector<1x4xf32>
    %48 = arith.truncf %45 : vector<2x16xf32> to vector<2x16xbf16>
    %cst_33 = arith.constant dense<0.000000e+00> : vector<2x4xf32>
    %49 = tpu.matmul %48, %46, %cst_33 {dimension_numbers = #tpu.dot_dimension_numbers<[1], [0], [0], [1], [0, 0, 1, 1], [], []>} : vector<2x16xbf16>, vector<16x4xbf16>, vector<2x4xf32> -> vector<2x4xf32>
    %50 = vector.broadcast %47 : vector<1x4xf32> to vector<2x4xf32>
    %51 = arith.addf %49, %50 : vector<2x4xf32>
    %52 = arith.truncf %51 : vector<2x4xf32> to vector<2x4xbf16>
    %c0_34 = arith.constant 0 : index
    %c0_35 = arith.constant 0 : index
    %53 = vector.load %arg14[%c0_34, %c0_35] : memref<4x16xbf16, #tpu.memory_space<vmem>>, vector<4x16xbf16>
    %cst_36 = arith.constant dense<0.000000e+00> : vector<2x16xf32>
    %54 = tpu.matmul %52, %53, %cst_36 {dimension_numbers = #tpu.dot_dimension_numbers<[1], [0], [0], [1], [0, 0, 1, 1], [], []>} : vector<2x4xbf16>, vector<4x16xbf16>, vector<2x16xf32> -> vector<2x16xf32>
    %c0_37 = arith.constant 0 : index
    %c0_38 = arith.constant 0 : index
    %55 = vector.load %arg15[%c0_37, %c0_38] : memref<1x16xf32, #tpu.memory_space<vmem>>, vector<1x16xf32>
    %56 = vector.broadcast %55 : vector<1x16xf32> to vector<2x16xf32>
    %57 = arith.addf %54, %56 : vector<2x16xf32>
    %58 = arith.truncf %57 : vector<2x16xf32> to vector<2x16xbf16>
    %c0_39 = arith.constant 0 : index
    %c0_40 = arith.constant 0 : index
    %59 = vector.load %arg16[%c0_39, %c0_40] : memref<16x32xbf16, #tpu.memory_space<vmem>>, vector<16x32xbf16>
    %cst_41 = arith.constant dense<0.000000e+00> : vector<2x32xf32>
    %60 = tpu.matmul %58, %59, %cst_41 {dimension_numbers = #tpu.dot_dimension_numbers<[1], [0], [0], [1], [0, 0, 1, 1], [], []>} : vector<2x16xbf16>, vector<16x32xbf16>, vector<2x32xf32> -> vector<2x32xf32>
    %c0_42 = arith.constant 0 : index
    %c0_43 = arith.constant 0 : index
    %61 = vector.load %arg17[%c0_42, %c0_43] : memref<1x32xf32, #tpu.memory_space<vmem>>, vector<1x32xf32>
    %62 = vector.broadcast %61 : vector<1x32xf32> to vector<2x32xf32>
    %63 = arith.addf %60, %62 : vector<2x32xf32>
    %64 = arith.truncf %63 : vector<2x32xf32> to vector<2x32xbf16>
    %c0_44 = arith.constant 0 : index
    %c0_45 = arith.constant 0 : index
    %65 = vector.load %arg18[%c0_44, %c0_45] : memref<32x64xbf16, #tpu.memory_space<vmem>>, vector<32x64xbf16>
    %cst_46 = arith.constant dense<0.000000e+00> : vector<2x64xf32>
    %66 = tpu.matmul %64, %65, %cst_46 {dimension_numbers = #tpu.dot_dimension_numbers<[1], [0], [0], [1], [0, 0, 1, 1], [], []>} : vector<2x32xbf16>, vector<32x64xbf16>, vector<2x64xf32> -> vector<2x64xf32>
    %c0_47 = arith.constant 0 : index
    %c0_48 = arith.constant 0 : index
    %67 = vector.load %arg19[%c0_47, %c0_48] : memref<1x64xf32, #tpu.memory_space<vmem>>, vector<1x64xf32>
    %68 = vector.broadcast %67 : vector<1x64xf32> to vector<2x64xf32>
    %69 = arith.addf %66, %68 : vector<2x64xf32>
    %70 = arith.truncf %69 : vector<2x64xf32> to vector<2x64xbf16>
    %c0_49 = arith.constant 0 : index
    %c0_50 = arith.constant 0 : index
    %71 = vector.load %arg20[%c0_49, %c0_50] : memref<64x128xbf16, #tpu.memory_space<vmem>>, vector<64x128xbf16>
    %cst_51 = arith.constant dense<0.000000e+00> : vector<2x128xf32>
    %72 = tpu.matmul %70, %71, %cst_51 {dimension_numbers = #tpu.dot_dimension_numbers<[1], [0], [0], [1], [0, 0, 1, 1], [], []>} : vector<2x64xbf16>, vector<64x128xbf16>, vector<2x128xf32> -> vector<2x128xf32>
    %c0_52 = arith.constant 0 : index
    %c0_53 = arith.constant 0 : index
    %73 = vector.load %arg21[%c0_52, %c0_53] : memref<1x128xf32, #tpu.memory_space<vmem>>, vector<1x128xf32>
    %74 = vector.broadcast %73 : vector<1x128xf32> to vector<2x128xf32>
    %75 = arith.addf %72, %74 : vector<2x128xf32>
    %76 = arith.truncf %75 : vector<2x128xf32> to vector<2x128xbf16>
    %c0_54 = arith.constant 0 : index
    %c0_55 = arith.constant 0 : index
    %77 = vector.load %arg22[%c0_54, %c0_55] : memref<128x8xbf16, #tpu.memory_space<vmem>>, vector<128x8xbf16>
    %cst_56 = arith.constant dense<0.000000e+00> : vector<2x8xf32>
    %78 = tpu.matmul %76, %77, %cst_56 {dimension_numbers = #tpu.dot_dimension_numbers<[1], [0], [0], [1], [0, 0, 1, 1], [], []>} : vector<2x128xbf16>, vector<128x8xbf16>, vector<2x8xf32> -> vector<2x8xf32>
    %c0_57 = arith.constant 0 : index
    %c0_58 = arith.constant 0 : index
    %79 = vector.load %arg23[%c0_57, %c0_58] : memref<1x8xf32, #tpu.memory_space<vmem>>, vector<1x8xf32>
    %80 = vector.broadcast %79 : vector<1x8xf32> to vector<2x8xf32>
    %81 = arith.addf %78, %80 : vector<2x8xf32>
    %c0_59 = arith.constant 0 : index
    %c0_60 = arith.constant 0 : index
    %82 = vector.load %arg25[%c0_59, %c0_60] : memref<2x8xf32, #tpu.memory_space<vmem>>, vector<2x8xf32>
    tpu.vector_store %arg25[%c0_59, %c0_60], %81 {strides = array<i32>} : memref<2x8xf32, #tpu.memory_space<vmem>>, vector<2x8xf32>,
    %cst_61 = arith.constant dense<0xFF800000> : vector<2xf32>
    %83 = vector.multi_reduction <maximumf>, %51, %cst_61 [1] : vector<2x4xf32> to vector<2xf32>
    %84 = vector.shape_cast %83 : vector<2xf32> to vector<2x1xf32>
    %85 = vector.broadcast %84 : vector<2x1xf32> to vector<2x4xf32>
    %86 = arith.subf %51, %85 : vector<2x4xf32>
    %87 = math.exp %86 : vector<2x4xf32>
    %cst_62 = arith.constant dense<0.000000e+00> : vector<2xf32>
    %88 = vector.multi_reduction <add>, %87, %cst_62 [1] : vector<2x4xf32> to vector<2xf32>
    %89 = vector.shape_cast %88 : vector<2xf32> to vector<2x1xf32>
    %90 = vector.broadcast %89 : vector<2x1xf32> to vector<2x4xf32>
    %91 = arith.divf %87, %90 : vector<2x4xf32>
    %c0_63 = arith.constant 0 : index
    %c0_64 = arith.constant 0 : index
    %92 = vector.load %arg26[%c0_63, %c0_64] : memref<2x4xf32, #tpu.memory_space<vmem>>, vector<2x4xf32>
    tpu.vector_store %arg26[%c0_63, %c0_64], %91 {strides = array<i32>} : memref<2x4xf32, #tpu.memory_space<vmem>>, vector<2x4xf32>,
    return
  }
  func.func @transform_0(%arg0: i32) -> (i32, i32) {
    %c0_i32 = arith.constant 0 : i32
    %c0_i32_0 = arith.constant 0 : i32
    return %arg0, %c0_i32 : i32, i32
  }
  func.func @transform_1(%arg0: i32) -> (i32, i32) {
    %c0_i32 = arith.constant 0 : i32
    %c0_i32_0 = arith.constant 0 : i32
    %c0_i32_1 = arith.constant 0 : i32
    return %c0_i32, %c0_i32_0 : i32, i32
  }
  func.func @transform_2(%arg0: i32) -> (i32, i32) {
    %c0_i32 = arith.constant 0 : i32
    %c0_i32_0 = arith.constant 0 : i32
    %c0_i32_1 = arith.constant 0 : i32
    return %c0_i32, %c0_i32_0 : i32, i32
  }
  func.func @transform_3(%arg0: i32) -> (i32, i32) {
    %c0_i32 = arith.constant 0 : i32
    %c0_i32_0 = arith.constant 0 : i32
    %c0_i32_1 = arith.constant 0 : i32
    return %c0_i32, %c0_i32_0 : i32, i32
  }
  func.func @transform_4(%arg0: i32) -> (i32, i32) {
    %c0_i32 = arith.constant 0 : i32
    %c0_i32_0 = arith.constant 0 : i32
    %c0_i32_1 = arith.constant 0 : i32
    return %c0_i32, %c0_i32_0 : i32, i32
  }
  func.func @transform_5(%arg0: i32) -> (i32, i32) {
    %c0_i32 = arith.constant 0 : i32
    %c0_i32_0 = arith.constant 0 : i32
    %c0_i32_1 = arith.constant 0 : i32
    return %c0_i32, %c0_i32_0 : i32, i32
  }
  func.func @transform_6(%arg0: i32) -> (i32, i32) {
    %c0_i32 = arith.constant 0 : i32
    %c0_i32_0 = arith.constant 0 : i32
    %c0_i32_1 = arith.constant 0 : i32
    return %c0_i32, %c0_i32_0 : i32, i32
  }
  func.func @transform_7(%arg0: i32) -> (i32, i32) {
    %c0_i32 = arith.constant 0 : i32
    %c0_i32_0 = arith.constant 0 : i32
    %c0_i32_1 = arith.constant 0 : i32
    return %c0_i32, %c0_i32_0 : i32, i32
  }
  func.func @transform_8(%arg0: i32) -> (i32, i32) {
    %c0_i32 = arith.constant 0 : i32
    %c0_i32_0 = arith.constant 0 : i32
    %c0_i32_1 = arith.constant 0 : i32
    return %c0_i32, %c0_i32_0 : i32, i32
  }
  func.func @transform_9(%arg0: i32) -> (i32, i32) {
    %c0_i32 = arith.constant 0 : i32
    %c0_i32_0 = arith.constant 0 : i32
    %c0_i32_1 = arith.constant 0 : i32
    return %c0_i32, %c0_i32_0 : i32, i32
  }
  func.func @transform_10(%arg0: i32) -> (i32, i32) {
    %c0_i32 = arith.constant 0 : i32
    %c0_i32_0 = arith.constant 0 : i32
    %c0_i32_1 = arith.constant 0 : i32
    return %c0_i32, %c0_i32_0 : i32, i32
  }
  func.func @transform_11(%arg0: i32) -> (i32, i32) {
    %c0_i32 = arith.constant 0 : i32
    %c0_i32_0 = arith.constant 0 : i32
    %c0_i32_1 = arith.constant 0 : i32
    return %c0_i32, %c0_i32_0 : i32, i32
  }
  func.func @transform_12(%arg0: i32) -> (i32, i32) {
    %c0_i32 = arith.constant 0 : i32
    %c0_i32_0 = arith.constant 0 : i32
    %c0_i32_1 = arith.constant 0 : i32
    return %c0_i32, %c0_i32_0 : i32, i32
  }
  func.func @transform_13(%arg0: i32) -> (i32, i32) {
    %c0_i32 = arith.constant 0 : i32
    %c0_i32_0 = arith.constant 0 : i32
    %c0_i32_1 = arith.constant 0 : i32
    return %c0_i32, %c0_i32_0 : i32, i32
  }
  func.func @transform_14(%arg0: i32) -> (i32, i32) {
    %c0_i32 = arith.constant 0 : i32
    %c0_i32_0 = arith.constant 0 : i32
    %c0_i32_1 = arith.constant 0 : i32
    return %c0_i32, %c0_i32_0 : i32, i32
  }
  func.func @transform_15(%arg0: i32) -> (i32, i32) {
    %c0_i32 = arith.constant 0 : i32
    %c0_i32_0 = arith.constant 0 : i32
    %c0_i32_1 = arith.constant 0 : i32
    return %c0_i32, %c0_i32_0 : i32, i32
  }
  func.func @transform_16(%arg0: i32) -> (i32, i32) {
    %c0_i32 = arith.constant 0 : i32
    %c0_i32_0 = arith.constant 0 : i32
    %c0_i32_1 = arith.constant 0 : i32
    return %c0_i32, %c0_i32_0 : i32, i32
  }
  func.func @transform_17(%arg0: i32) -> (i32, i32) {
    %c0_i32 = arith.constant 0 : i32
    %c0_i32_0 = arith.constant 0 : i32
    %c0_i32_1 = arith.constant 0 : i32
    return %c0_i32, %c0_i32_0 : i32, i32
  }
  func.func @transform_18(%arg0: i32) -> (i32, i32) {
    %c0_i32 = arith.constant 0 : i32
    %c0_i32_0 = arith.constant 0 : i32
    %c0_i32_1 = arith.constant 0 : i32
    return %c0_i32, %c0_i32_0 : i32, i32
  }
  func.func @transform_19(%arg0: i32) -> (i32, i32) {
    %c0_i32 = arith.constant 0 : i32
    %c0_i32_0 = arith.constant 0 : i32
    %c0_i32_1 = arith.constant 0 : i32
    return %c0_i32, %c0_i32_0 : i32, i32
  }
  func.func @transform_20(%arg0: i32) -> (i32, i32) {
    %c0_i32 = arith.constant 0 : i32
    %c0_i32_0 = arith.constant 0 : i32
    %c0_i32_1 = arith.constant 0 : i32
    return %c0_i32, %c0_i32_0 : i32, i32
  }
  func.func @transform_21(%arg0: i32) -> (i32, i32) {
    %c0_i32 = arith.constant 0 : i32
    %c0_i32_0 = arith.constant 0 : i32
    %c0_i32_1 = arith.constant 0 : i32
    return %c0_i32, %c0_i32_0 : i32, i32
  }
  func.func @transform_22(%arg0: i32) -> (i32, i32) {
    %c0_i32 = arith.constant 0 : i32
    %c0_i32_0 = arith.constant 0 : i32
    %c0_i32_1 = arith.constant 0 : i32
    return %c0_i32, %c0_i32_0 : i32, i32
  }
  func.func @transform_23(%arg0: i32) -> (i32, i32) {
    %c0_i32 = arith.constant 0 : i32
    %c0_i32_0 = arith.constant 0 : i32
    return %arg0, %c0_i32 : i32, i32
  }
  func.func @transform_24(%arg0: i32) -> (i32, i32) {
    %c0_i32 = arith.constant 0 : i32
    %c0_i32_0 = arith.constant 0 : i32
    return %arg0, %c0_i32 : i32, i32
  }
  func.func @transform_25(%arg0: i32) -> (i32, i32) {
    %c0_i32 = arith.constant 0 : i32
    %c0_i32_0 = arith.constant 0 : i32
    return %arg0, %c0_i32 : i32, i32
  }
}

module attributes {stable_mosaic.version = 11 : i64} {
  func.func @_matmul_kernel(%arg0: i32, %arg1: memref<338x16xbf16, #tpu.memory_space<vmem>>, %arg2: memref<16x256xbf16, #tpu.memory_space<vmem>>, %arg3: memref<338x256xf32, #tpu.memory_space<vmem>>) attributes {dimension_semantics = [#tpu.dimension_semantics<parallel>], iteration_bounds = array<i64: 1>, scalar_prefetch = 0 : i64, scratch_operands = 0 : i64, tpu.core_type = #tpu.core_type<tc>, window_params = [{transform_indices = @transform_0, window_bounds = array<i64: 338, 16>}, {pipeline_mode = #tpu.pipeline_mode<synchronous>, transform_indices = @transform_1, window_bounds = array<i64: 16, 256>}, {transform_indices = @transform_2, window_bounds = array<i64: 338, 256>}]} {
    %c0 = arith.constant 0 : index
    %c0_0 = arith.constant 0 : index
    %0 = vector.load %arg1[%c0, %c0_0] : memref<338x16xbf16, #tpu.memory_space<vmem>>, vector<338x16xbf16>
    %c0_1 = arith.constant 0 : index
    %c0_2 = arith.constant 0 : index
    %1 = vector.load %arg2[%c0_1, %c0_2] : memref<16x256xbf16, #tpu.memory_space<vmem>>, vector<16x256xbf16>
    %cst = arith.constant dense<0.000000e+00> : vector<338x256xf32>
    %2 = tpu.matmul %0, %1, %cst {dimension_numbers = #tpu.dot_dimension_numbers<[1], [0], [0], [1], [0, 0, 1, 1], [], []>} : vector<338x16xbf16>, vector<16x256xbf16>, vector<338x256xf32> -> vector<338x256xf32>
    %c0_3 = arith.constant 0 : index
    %c0_4 = arith.constant 0 : index
    %3 = vector.load %arg3[%c0_3, %c0_4] : memref<338x256xf32, #tpu.memory_space<vmem>>, vector<338x256xf32>
    tpu.vector_store %arg3[%c0_3, %c0_4], %2 {strides = array<i32>} : memref<338x256xf32, #tpu.memory_space<vmem>>, vector<338x256xf32>,
    return
  }
  func.func @transform_0(%arg0: i32) -> (i32, i32) {
    %c0_i32 = arith.constant 0 : i32
    %c0_i32_0 = arith.constant 0 : i32
    return %arg0, %c0_i32 : i32, i32
  }
  func.func @transform_1(%arg0: i32) -> (i32, i32) {
    %c0_i32 = arith.constant 0 : i32
    %c0_i32_0 = arith.constant 0 : i32
    %c0_i32_1 = arith.constant 0 : i32
    return %c0_i32, %c0_i32_0 : i32, i32
  }
  func.func @transform_2(%arg0: i32) -> (i32, i32) {
    %c0_i32 = arith.constant 0 : i32
    %c0_i32_0 = arith.constant 0 : i32
    return %arg0, %c0_i32 : i32, i32
  }
}

module attributes {stable_mosaic.version = 11 : i64} {
  func.func @_matmul_kernel(%arg0: i32, %arg1: memref<578x8xbf16, #tpu.memory_space<vmem>>, %arg2: memref<8x12xbf16, #tpu.memory_space<vmem>>, %arg3: memref<578x12xf32, #tpu.memory_space<vmem>>) attributes {dimension_semantics = [#tpu.dimension_semantics<parallel>], iteration_bounds = array<i64: 1>, scalar_prefetch = 0 : i64, scratch_operands = 0 : i64, tpu.core_type = #tpu.core_type<tc>, window_params = [{transform_indices = @transform_0, window_bounds = array<i64: 578, 8>}, {pipeline_mode = #tpu.pipeline_mode<synchronous>, transform_indices = @transform_1, window_bounds = array<i64: 8, 12>}, {transform_indices = @transform_2, window_bounds = array<i64: 578, 12>}]} {
    %c0 = arith.constant 0 : index
    %c0_0 = arith.constant 0 : index
    %0 = vector.load %arg1[%c0, %c0_0] : memref<578x8xbf16, #tpu.memory_space<vmem>>, vector<578x8xbf16>
    %c0_1 = arith.constant 0 : index
    %c0_2 = arith.constant 0 : index
    %1 = vector.load %arg2[%c0_1, %c0_2] : memref<8x12xbf16, #tpu.memory_space<vmem>>, vector<8x12xbf16>
    %cst = arith.constant dense<0.000000e+00> : vector<578x12xf32>
    %2 = tpu.matmul %0, %1, %cst {dimension_numbers = #tpu.dot_dimension_numbers<[1], [0], [0], [1], [0, 0, 1, 1], [], []>} : vector<578x8xbf16>, vector<8x12xbf16>, vector<578x12xf32> -> vector<578x12xf32>
    %c0_3 = arith.constant 0 : index
    %c0_4 = arith.constant 0 : index
    %3 = vector.load %arg3[%c0_3, %c0_4] : memref<578x12xf32, #tpu.memory_space<vmem>>, vector<578x12xf32>
    tpu.vector_store %arg3[%c0_3, %c0_4], %2 {strides = array<i32>} : memref<578x12xf32, #tpu.memory_space<vmem>>, vector<578x12xf32>,
    return
  }
  func.func @transform_0(%arg0: i32) -> (i32, i32) {
    %c0_i32 = arith.constant 0 : i32
    %c0_i32_0 = arith.constant 0 : i32
    return %arg0, %c0_i32 : i32, i32
  }
  func.func @transform_1(%arg0: i32) -> (i32, i32) {
    %c0_i32 = arith.constant 0 : i32
    %c0_i32_0 = arith.constant 0 : i32
    %c0_i32_1 = arith.constant 0 : i32
    return %c0_i32, %c0_i32_0 : i32, i32
  }
  func.func @transform_2(%arg0: i32) -> (i32, i32) {
    %c0_i32 = arith.constant 0 : i32
    %c0_i32_0 = arith.constant 0 : i32
    return %arg0, %c0_i32 : i32, i32
  }
}

</mosaic_0001>

<bundles_post_ra>
// kernel: classification_ae_forward.5
= control target key start
LH: loop header
LB: loop body
LE: loop exit
PB: predicated region body
PF: predicated region fallthrough
CT: control target
= control target key end

     0   :  { %9 = vsyncpa [#allocation3], 0  ;;  %s744_s15 = smov 0   ;;  %s746_s16 = smov 0   ;;  %s846_s0 = inlined_call_operand.vmem [shape: f32[2,8], index: 0, kind: input, shape index: {}]   ;;  %s847_s1 = inlined_call_operand.vmem [shape: f32[25,1], index: 1, kind: input, shape index: {}]   ;;  %s848_s2 = inlined_call_operand.vmem [shape: f32[25,1], index: 2, kind: input, shape index: {}]   ;;  %s849_s3 = inlined_call_operand.hbm [shape: bf16[8,512], index: 3, kind: input, shape index: {}]   ;;  %s850_s4 = inlined_call_operand.vmem [shape: f32[2,25,512], index: 4, kind: output, shape index: {}]  }
   0x1   :  { %s748_s17 = smov 0  }
   0x2 LB: > { %s598_s18 = sadd.s32 4294967295, %s715_s17   ;;  %s27_s19 = sadd.s32 1, %s711_s16  ;;  %s715_s17 = sphi %s748_s17, %s15_s17   ;;  %s711_s16 = sphi %s746_s16, %s854_s16   ;;  %s707_s15 = sphi %s744_s15, %s853_s15  }
   0x3   : > { %p29_p0 = scmp.ge.s32.totalorder %s27_s19, 2  ;;  %p600_p1 = scmp.ge.s32.totalorder %s715_s17, 1 }
   0x4   : > { %p154_p2 = scmp.lt.s32.totalorder %s715_s17, 3  ;;  %p769_p4 = scmp.eq.s32.totalorder %s598_s18, 0 }
   0x5   : > { %s856_s19 = smov (%p29_p0, %s27_s19), 0  ;;  %s717_s22 = smov [#allocation2]  }
   0x6   : > { %p765_p3 = pnand %p600_p1, %p154_p2  ;;  %s188_s23 = sshll.u32 %s717_s22, 4  ;;  %s189_s23 = int_to_ptr.vmem [resolvable:$true] %s188_s23 }
   0x7   : > { %s674_s24 = scalar_lea.vmem %s189_s23, 256  ;;  %p682_p11 = scmp.lt.s32.totalorder %s189_s23, %s189_s23 }
   0x8   : > { %p625_p5 = pneg %p765_p3  ;;  %p675_p8 = scmp.ne.s32.totalorder %s189_s23, %s674_s24 }
   0x9   : > { %p683_p12 = scmp.lt.s32.totalorder %s674_s24, %s674_s24 }
   0xa   : > { %p626_p6 = pnand %p769_p4, %p625_p5 }
   0xb   : > { %p684_p13 = por %p683_p12, %p682_p11 }
   0xc   : > { %p665_p7 = pneg %p626_p6 }
   0xe   : > { %p677_p9 = pnand %p675_p8, %p665_p7 }
  0x10   : > { %p678_p10 = pneg %p677_p9 }
  0x12   : > { %p685_p0 = pnand %p684_p13, %p678_p10 }
  0x14   : > { %688 = shalt.err (!%p685_p0)
}
  0x15   : > { %628 = dma.hbm_to_vmem [thread:$0]  (!%p626_p6), %s849_s3, 256, %s189_s23, [#allocation3]  }
  0x16   : > { %201 = sbr.rel (%p765_p3) target bundleno = 373 (0x175), region = 36 }
  0x1b   : > { %702 = dma.done.wait (%p769_p4), [#allocation3], 256  }
  0x1c   : > { %704 = vsyncadd (%p769_p4), [#allocation3], 4294967040  ;;  %v718_v0 = vmov 0   ;;  %v296_v1 = vld [vmem:[%s848_s2] sm:$0xff]  ;;  %v297_v3 = vld [vmem:[%s848_s2 + $0x8] sm:$0xff]  ;;  %vm345_vm0 = vcmask 1043456   ;;  %v288_v17 = vlaneseq  ;;  %s261_s23 = scalar_lea.vmem %s846_s0, %s707_s15 }
  0x1d   : > { %658 = vset.pattern.permute.xlu1 %v718_v0  ;;  %657 = vset.pattern.permute.xlu0 %v718_v0  ;;  %v264_v2 = vld [vmem:[%s847_s1] sm:$0xff]  ;;  %v265_v4 = vld [vmem:[%s847_s1 + $0x8] sm:$0xff]  ;;  %v267_v11 = vld [vmem:[%s847_s1 + $0x18] sm:$0x1]  ;;  %vm338_vm1 = vcmask 64512   ;;  %p250_p1 = scmp.lt.s32.totalorder %s707_s15, 1 }
  0x1e   : > { %390 = vmatprep.mubr.bf16.mxu0 %v718_v0  ;;  %443 = vmatprep.mubr.bf16.mxu1 %v718_v0  ;;  %v326_v5 = vld [vmem:[#allocation2] sm:$0xff]  ;;  %v327_v6 = vld [vmem:[#allocation2 + $0x8] sm:$0xff]  ;;  %v266_v12 = vld [vmem:[%s847_s1 + $0x10] sm:$0xff]  ;;  %v289_v18 = vshrl.u32 %v288_v17, 7 }
  0x1f   : > { %302 = vperm.xlu1 %658, %v296_v1   ;;  %270 = vperm.xlu0 %657, %v264_v2   ;;  %v609_v7 = vcombine.high %v326_v5, %v326_v5  ;;  %v611_v8 = vcombine.high %v327_v6, %v327_v6  ;;  %v608_v9 = vcombine.low %v326_v5, %v326_v5  ;;  %v299_v15 = vld [vmem:[%s848_s2 + $0x18] sm:$0x1]  ;;  %v298_v16 = vld [vmem:[%s848_s2 + $0x10] sm:$0xff]  ;;  %v262_v19 = vld [vmem:[%s261_s23] sm:$0x1]  ;;  %s858_s15 = smov (!%p250_p1, %s707_s15), 1 }
  0x20   : > { %v610_v10 = vcombine.low %v327_v6, %v327_v6  ;;  %v290_v20 = vsub.s32 0, %v289_v18  ;;  %v263_v21 = vmax.f32 %v262_v19, 0.0  ;;  %s620_s24 = sshll.u32 %s858_s15, 7 }
  0x21   : > { %612 = vmatprep.subr.msk.bf16.mxu0 %vm345_vm0, %v609_v7  ;;  %615 = vmatprep.subr.msk.bf16.mxu1 %vm345_vm0, %v611_v8  ;;  %v347_v13 = vsel %vm345_vm0, %v608_v9, 0  ;;  %s819_s27 = scalar_lea.vmem %s850_s4, %s620_s24 }
  0x22   : > { %v353_v14 = vsel %vm345_vm0, %v610_v10, 0  ;;  %373 = vmatpush1.bf16.msra.mxu0 %v347_v13  ;;  %v291_v22 = vrot.slane %v263_v21, %v290_v20 }
  0x23   : > { %307 = vperm.xlu1 %658, %v297_v3   ;;  %275 = vperm.xlu0 %657, %v265_v4  }
  0x24   : > { %426 = vmatpush1.bf16.msra.mxu1 %v353_v14 }
  0x27   : > { %285 = vperm.xlu1 %658, %v267_v11   ;;  %280 = vperm.xlu0 %657, %v266_v12  }
  0x2b   : > { %317 = vperm.xlu1 %658, %v299_v15   ;;  %312 = vperm.xlu0 %657, %v298_v16  }
  0x9a   : > { %v303_v23 = vpop.permute.xlu1 %302  ;;  %v271_v24 = vpop.permute.xlu0 %270 }
  0x9b   : > { %v292_v25 = vmul.f32 %v291_v22, %v271_v24 }
  0x9d   : > { %v320_v29 = vadd.f32 %v303_v23, %v292_v25 }
  0x9e   : > { %v308_v26 = vpop.permute.xlu1 %307  ;;  %v276_v27 = vpop.permute.xlu0 %275 }
  0x9f   : > { %v293_v28 = vmul.f32 %v291_v22, %v276_v27 }
  0xa1   : > { %v321_v30 = vadd.f32 %v308_v26, %v293_v28 }
  0xa2   : > { %v286_v31 = vpop.permute.xlu1 %285  ;;  %v281_v32 = vpop.permute.xlu0 %280 }
  0xa3   : > { %v324_v33 = vpack.c.bf16 %v321_v30, %v320_v29  ;;  %v295_v34 = vmul.f32 %v291_v22, %v286_v31  ;;  %v294_v35 = vmul.f32 %v291_v22, %v281_v32 }
  0xa5   : > { %613 = vmatmul.mubr.msk.bf16.vlgmr.msra.gmra.mxu0 %vm338_vm1, %v324_v33  ;;  %616 = vmatmul.mubr.msk.bf16.vlgmr.msra.gmra.mxu1 %vm338_vm1, %v324_v33 }
  0xa6   : > { %v318_v36 = vpop.permute.xlu1 %317  ;;  %v313_v37 = vpop.permute.xlu0 %312  ;;  %400 = vmatprep.mubr.bf16.mxu0 %v718_v0  ;;  %453 = vmatprep.mubr.bf16.mxu1 %v718_v0 }
  0xa7   : > { %v323_v38 = vadd.f32 %v318_v36, %v295_v34  ;;  %v322_v39 = vadd.f32 %v313_v37, %v294_v35 }
  0xa9   : > { %v325_v40 = vpack.c.bf16 %v323_v38, %v322_v39 }
  0xad   : > { %614 = vmatmul.mubr.msk.bf16.gmra.mxu0 %vm338_vm1, %v325_v40  ;;  %617 = vmatmul.mubr.msk.bf16.gmra.mxu1 %vm338_vm1, %v325_v40 }
 0x165   : > { %v392_v41 = vpop.f32.mrf.mxu0  ;;  %v445_v42 = vpop.f32.mrf.mxu1 }
 0x166   : > { %464 = vst [vmem:[%s819_s27] sm:$0xff] %v392_v41  ;;  %466 = vst [vmem:[%s819_s27 + $0x10] sm:$0xff] %v445_v42 }
 0x167   : > { %v394_v43 = vpop.f32.mrf.mxu0  ;;  %v447_v44 = vpop.f32.mrf.mxu1 }
 0x168   : > { %465 = vst [vmem:[%s819_s27 + $0x8] sm:$0xff] %v394_v43  ;;  %467 = vst [vmem:[%s819_s27 + $0x18] sm:$0xff] %v447_v44 }
 0x169   : > { %v396_v45 = vpop.f32.mrf.mxu0  ;;  %v449_v46 = vpop.f32.mrf.mxu1 }
 0x16a   : > { %468 = vst [vmem:[%s819_s27 + $0x20] sm:$0xff] %v396_v45  ;;  %470 = vst [vmem:[%s819_s27 + $0x30] sm:$0xff] %v449_v46 }
 0x16b   : > { %v398_v47 = vpop.f32.mrf.mxu0  ;;  %v451_v48 = vpop.f32.mrf.mxu1 }
 0x16c   : > { %469 = vst [vmem:[%s819_s27 + $0x28] sm:$0xff] %v398_v47  ;;  %471 = vst [vmem:[%s819_s27 + $0x38] sm:$0xff] %v451_v48 }
 0x16d   : > { %v402_v49 = vpop.f32.mrf.mxu0  ;;  %v455_v50 = vpop.f32.mrf.mxu1 }
 0x16e   : > { %472 = vst [vmem:[%s819_s27 + $0x40] sm:$0xff] %v402_v49  ;;  %474 = vst [vmem:[%s819_s27 + $0x50] sm:$0xff] %v455_v50 }
 0x16f   : > { %v404_v51 = vpop.f32.mrf.mxu0  ;;  %v457_v52 = vpop.f32.mrf.mxu1 }
 0x170   : > { %473 = vst [vmem:[%s819_s27 + $0x48] sm:$0xff] %v404_v51  ;;  %475 = vst [vmem:[%s819_s27 + $0x58] sm:$0xff] %v457_v52 }
 0x171   : > { %v406_v53 = vpop.f32.mrf.mxu0  ;;  %v459_v54 = vpop.f32.mrf.mxu1 }
 0x172   : > { %476 = vst [vmem:[%s819_s27 + $0x60] sm:$0x1] %v406_v53  ;;  %478 = vst [vmem:[%s819_s27 + $0x70] sm:$0x1] %v459_v54 }
 0x173   : > { %v408_v55 = vpop.f32.mrf.mxu0  ;;  %v461_v56 = vpop.f32.mrf.mxu1 }
 0x174   : > { %477 = vst [vmem:[%s819_s27 + $0x68] sm:$0x1] %v408_v55  ;;  %479 = vst [vmem:[%s819_s27 + $0x78] sm:$0x1] %v461_v56 }
 0x175 PF: > { %s15_s17 = sadd.s32 1, %s715_s17   ;;  %s853_s15 = smov %s711_s16 }
 0x176   : > { %p12_p2 = scmp.ge.s32.totalorder %s15_s17, 4   ;;  %s854_s16 = smov %s856_s19 }
 0x178   :  { %14 = sbr.rel (!%p12_p2) target bundleno = 2 (0x2), region = 75 }
 0x17d   :  { %512 = vsyncpa [#allocation3], 1 }
 0x17e   :  { %514 = vsyncpa [#allocation3 + $0x1], 1 }

// kernel: classification_ae_forward.4
= control target key start
LH: loop header
LB: loop body
LE: loop exit
PB: predicated region body
PF: predicated region fallthrough
CT: control target
= control target key end

     0   :  { %s2218_s0 = inlined_call_operand.hbm [shape: f32[2,64], index: 0, kind: input, shape index: {}]   ;;  %s2219_s1 = inlined_call_operand.vmem [shape: bf16[64,8], index: 1, kind: input, shape index: {}]   ;;  %s2220_s2 = inlined_call_operand.<no memory space> [shape: f32[1,1], index: 2, kind: input, shape index: {}]   ;;  %s2221_s3 = inlined_call_operand.hbm [shape: bf16[8,128], index: 3, kind: input, shape index: {}]   ;;  %s2222_s4 = inlined_call_operand.hbm [shape: f32[1,128], index: 4, kind: input, shape index: {}]   ;;  %s2223_s5 = inlined_call_operand.vmem [shape: bf16[128,64], index: 5, kind: input, shape index: {}]   ;;  %s2224_s6 = inlined_call_operand.hbm [shape: f32[1,64], index: 6, kind: input, shape index: {}]   ;;  %s2225_s7 = inlined_call_operand.vmem [shape: bf16[64,32], index: 7, kind: input, shape index: {}]   ;;  %s2226_s8 = inlined_call_operand.hbm [shape: f32[1,32], index: 8, kind: input, shape index: {}]   ;;  %s2227_s9 = inlined_call_operand.vmem [shape: bf16[32,16], index: 9, kind: input, shape index: {}]   ;;  %s2228_s10 = inlined_call_operand.hbm [shape: f32[1,16], index: 10, kind: input, shape index: {}]   ;;  %s2229_s11 = inlined_call_operand.vmem [shape: bf16[16,4], index: 11, kind: input, shape index: {}]   ;;  %s2230_s12 = inlined_call_operand.hbm [shape: f32[1,4], index: 12, kind: input, shape index: {}]   ;;  %s2231_s13 = inlined_call_operand.hbm [shape: bf16[4,16], index: 13, kind: input, shape index: {}]   ;;  %s2232_s14 = inlined_call_operand.hbm [shape: f32[1,16], index: 14, kind: input, shape index: {}]   ;;  %s2233_s15 = inlined_call_operand.hbm [shape: bf16[16,32], index: 15, kind: input, shape index: {}]   ;;  %s2234_s16 = inlined_call_operand.hbm [shape: f32[1,32], index: 16, kind: input, shape index: {}]   ;;  %s2235_s17 = inlined_call_operand.hbm [shape: bf16[32,64], index: 17, kind: input, shape index: {}]   ;;  %s2236_s18 = inlined_call_operand.hbm [shape: f32[1,64], index: 18, kind: input, shape index: {}]   ;;  %s2237_s19 = inlined_call_operand.hbm [shape: bf16[64,128], index: 19, kind: input, shape index: {}]   ;;  %s2238_s20 = inlined_call_operand.hbm [shape: f32[1,128], index: 20, kind: input, shape index: {}]   ;;  %s2239_s21 = inlined_call_operand.vmem [shape: bf16[128,8], index: 21, kind: input, shape index: {}]   ;;  %s2240_s22 = inlined_call_operand.hbm [shape: f32[1,8], index: 22, kind: input, shape index: {}]   ;;  %s2241_s23 = inlined_call_operand.vmem [shape: f32[2,8], index: 23, kind: output, shape index: {0}]   ;;  %s2242_s24 = inlined_call_operand.hbm [shape: f32[2,8], index: 24, kind: output, shape index: {1}]   ;;  %s2243_s25 = inlined_call_operand.hbm [shape: f32[2,4], index: 25, kind: output, shape index: {2}]  }
   0x1   :  { %2248 = sst [smem:[#allocation43_spill]] %s2218_s0 }
   0x2   :  { %2249 = sst [smem:[#allocation44_spill]] %s2219_s1 }
   0x3   :  { %2250 = sst [smem:[#allocation45_spill]] %s2220_s2 }
   0x4   :  { %2251 = sst [smem:[#allocation46_spill]] %s2221_s3 }
   0x5   :  { %2252 = sst [smem:[#allocation47_spill]] %s2222_s4 }
   0x6   :  { %2253 = sst [smem:[#allocation48_spill]] %s2223_s5 }
   0x7   :  { %2254 = sst [smem:[#allocation49_spill]] %s2224_s6 }
   0x8   :  { %2255 = sst [smem:[#allocation50_spill]] %s2225_s7 }
   0x9   :  { %2256 = sst [smem:[#allocation51_spill]] %s2226_s8 }
   0xa   :  { %2257 = sst [smem:[#allocation52_spill]] %s2227_s9 }
   0xb   :  { %32 = vsyncpa [#allocation4], 0 }
   0xc   :  { %33 = vsyncpa [#allocation7], 0 }
   0xd   :  { %34 = vsyncpa [#allocation10], 0 }
   0xe   :  { %35 = vsyncpa [#allocation13], 0 }
   0xf   :  { %36 = vsyncpa [#allocation16], 0 }
  0x10   :  { %37 = vsyncpa [#allocation19], 0 }
  0x11   :  { %38 = vsyncpa [#allocation22], 0 }
  0x12   :  { %39 = vsyncpa [#allocation25], 0 }
  0x13   :  { %40 = vsyncpa [#allocation28], 0 }
  0x14   :  { %41 = vsyncpa [#allocation5], 0 }
  0x15   :  { %42 = vsyncpa [#allocation31], 0  ;;  %s1853_s29 = smov [#allocation6]   ;;  %s1854_s6 = smov [#allocation9]  }
  0x16   :  { %s63_s2 = sshll.u32 %s1853_s29, 4  ;;  %s85_s30 = sshll.u32 %s1854_s6, 4  ;;  %s64_s2 = int_to_ptr.vmem [resolvable:$true] %s63_s2  ;;  %s86_s30 = int_to_ptr.vmem [resolvable:$true] %s85_s30 }
  0x17   :  { %s1479_s7 = scalar_lea.vmem %s64_s2, 64  ;;  %p1484_p1 = scmp.lt.s32.totalorder %s64_s2, %s64_s2 }
  0x18   :  { %p1480_p0 = scmp.ne.s32.totalorder %s64_s2, %s1479_s7  ;;  %p1485_p2 = scmp.lt.s32.totalorder %s1479_s7, %s1479_s7 }
  0x1a   :  { %p1486_p3 = por %p1485_p2, %p1484_p1 }
  0x1c   :  { %p1487_p4 = pnand %p1486_p3, %p1480_p0 }
  0x1e   :  { %1490 = shalt.err (!%p1487_p4)
}
  0x1f   :  { %s2258_s1 = sld [smem:[#allocation46_spill]]  ;;  %s1499_s8 = scalar_lea.vmem %s86_s30, 16 }
  0x20   :  { %p1500_p5 = scmp.ne.s32.totalorder %s86_s30, %s1499_s8  ;;  %s1503_s27 = scalar_lea.vmem %s86_s30, 32 }
  0x21   :  { %p1504_p6 = scmp.lt.s32.totalorder %s86_s30, %s86_s30  ;;  %p1505_p7 = scmp.lt.s32.totalorder %s1503_s27, %s1499_s8 }
  0x23   :  { %p1506_p8 = por %p1505_p7, %p1504_p6 }
  0x25   :  { %66 = dma.hbm_to_vmem [thread:$0]  %s2258_s1, 64, %s64_s2, [#allocation7]  }
  0x26   :  { %p1507_p9 = pnand %p1506_p8, %p1500_p5 }
  0x28   :  { %1510 = shalt.err (!%p1507_p9)
}
  0x29   :  { %s2259_s9 = sld [smem:[#allocation49_spill]]  ;;  %s1855_s5 = smov [#allocation12]  }
  0x2a   :  { %s109_s0 = sshll.u32 %s1855_s5, 4  ;;  %s1856_s29 = smov [#allocation15]   ;;  %s110_s0 = int_to_ptr.vmem [resolvable:$true] %s109_s0 }
  0x2b   :  { %s131_s6 = sshll.u32 %s1856_s29, 4  ;;  %s1519_s7 = scalar_lea.vmem %s110_s0, 16  ;;  %s132_s6 = int_to_ptr.vmem [resolvable:$true] %s131_s6 }
  0x2c   :  { %p1520_p10 = scmp.ne.s32.totalorder %s110_s0, %s1519_s7  ;;  %s1523_s2 = scalar_lea.vmem %s110_s0, 32 }
  0x2d   :  { %p1524_p11 = scmp.lt.s32.totalorder %s110_s0, %s110_s0  ;;  %p1525_p12 = scmp.lt.s32.totalorder %s1523_s2, %s1519_s7 }
  0x2f   :  { %88 = dma.hbm_to_vmem [thread:$0]  %s2259_s9, 16, %s86_s30, [#allocation10]  }
  0x30   :  { %p1526_p13 = por %p1525_p12, %p1524_p11 }
  0x32   :  { %p1527_p0 = pnand %p1526_p13, %p1520_p10 }
  0x34   :  { %1530 = shalt.err (!%p1527_p0)
}
  0x35   :  { %112 = dma.hbm_to_vmem [thread:$0]  %s2228_s10, 16, %s110_s0, [#allocation13]  }
  0x36   :  { %s1539_s1 = scalar_lea.vmem %s132_s6, 32  ;;  %p1544_p2 = scmp.lt.s32.totalorder %s132_s6, %s132_s6 }
  0x37   :  { %p1540_p1 = scmp.ne.s32.totalorder %s132_s6, %s1539_s1  ;;  %p1545_p3 = scmp.lt.s32.totalorder %s1539_s1, %s1539_s1 }
  0x39   :  { %p1546_p4 = por %p1545_p3, %p1544_p2 }
  0x3b   :  { %p1547_p5 = pnand %p1546_p4, %p1540_p1 }
  0x3d   :  { %1550 = shalt.err (!%p1547_p5)
}
  0x3e   :  { %134 = dma.hbm_to_vmem [thread:$0]  %s2231_s13, 32, %s132_s6, [#allocation16]  }
  0x3f   :  { %s1857_s27 = smov [#allocation18]  }
  0x40   :  { %s150_s4 = sshll.u32 %s1857_s27, 4  ;;  %s151_s4 = int_to_ptr.vmem [resolvable:$true] %s150_s4 }
  0x41   :  { %s1559_s28 = scalar_lea.vmem %s151_s4, 128  ;;  %p1564_p7 = scmp.lt.s32.totalorder %s151_s4, %s151_s4 }
  0x42   :  { %p1560_p6 = scmp.ne.s32.totalorder %s151_s4, %s1559_s28  ;;  %p1565_p8 = scmp.lt.s32.totalorder %s1559_s28, %s1559_s28 }
  0x44   :  { %p1566_p9 = por %p1565_p8, %p1564_p7 }
  0x46   :  { %p1567_p10 = pnand %p1566_p9, %p1560_p6 }
  0x48   :  { %1570 = shalt.err (!%p1567_p10)
}
  0x49   :  { %s1858_s10 = smov 64   ;;  %s1859_s9 = smov 4  }
  0x4a   :  { %156 = dma.hbm_to_vmem [thread:$0]  %s2233_s15, 128, %s151_s4, [#allocation19], %s1858_s10, %s1858_s10, %s1859_s9  }
  0x4b   :  { %s1860_s29 = smov [#allocation21]   ;;  %s1861_s13 = smov [#allocation24]  }
  0x4c   :  { %s172_s7 = sshll.u32 %s1860_s29, 4  ;;  %s194_s6 = sshll.u32 %s1861_s13, 4  ;;  %s173_s7 = int_to_ptr.vmem [resolvable:$true] %s172_s7  ;;  %s195_s6 = int_to_ptr.vmem [resolvable:$true] %s194_s6 }
  0x4d   :  { %s1579_s2 = scalar_lea.vmem %s173_s7, 256  ;;  %p1584_p12 = scmp.lt.s32.totalorder %s173_s7, %s173_s7 }
  0x4e   :  { %p1580_p11 = scmp.ne.s32.totalorder %s173_s7, %s1579_s2  ;;  %p1585_p13 = scmp.lt.s32.totalorder %s1579_s2, %s1579_s2 }
  0x50   :  { %p1586_p0 = por %p1585_p13, %p1584_p12 }
  0x52   :  { %p1587_p1 = pnand %p1586_p0, %p1580_p11 }
  0x54   :  { %1590 = shalt.err (!%p1587_p1)
}
  0x55   :  { %178 = dma.hbm_to_vmem [thread:$0]  %s2235_s17, 256, %s173_s7, [#allocation22], %s1858_s10, %s1858_s10, %s1859_s9  }
  0x56   :  { %s1599_s1 = scalar_lea.vmem %s195_s6, 512  ;;  %p1604_p3 = scmp.lt.s32.totalorder %s195_s6, %s195_s6 }
  0x57   :  { %p1600_p2 = scmp.ne.s32.totalorder %s195_s6, %s1599_s1  ;;  %p1605_p4 = scmp.lt.s32.totalorder %s1599_s1, %s1599_s1 }
  0x59   :  { %p1606_p5 = por %p1605_p4, %p1604_p3 }
  0x5b   :  { %p1607_p6 = pnand %p1606_p5, %p1600_p2 }
  0x5d   :  { %1610 = shalt.err (!%p1607_p6)
}
  0x5e   :  { %200 = dma.hbm_to_vmem [thread:$0]  %s2237_s19, 512, %s195_s6, [#allocation25], %s1858_s10, %s1858_s10, %s1859_s9  }
  0x5f   :  { %s1862_s8 = smov [#allocation3]   ;;  %s1863_s4 = smov [#allocation8]  }
  0x60   :  { %s49_s27 = sshll.u32 %s1862_s8, 4  ;;  %s73_s28 = sshll.u32 %s1863_s4, 4  ;;  %s50_s27 = int_to_ptr.vmem [resolvable:$true] %s49_s27  ;;  %s74_s28 = int_to_ptr.vmem [resolvable:$true] %s73_s28 }
  0x61   :  { %s1619_s5 = scalar_lea.vmem %s50_s27, 32  ;;  %p1624_p8 = scmp.lt.s32.totalorder %s50_s27, %s50_s27 }
  0x62   :  { %p1620_p7 = scmp.ne.s32.totalorder %s50_s27, %s1619_s5  ;;  %p1625_p9 = scmp.lt.s32.totalorder %s1619_s5, %s1619_s5 }
  0x64   :  { %p1626_p10 = por %p1625_p9, %p1624_p8 }
  0x66   :  { %p1627_p11 = pnand %p1626_p10, %p1620_p7 }
  0x68   :  { %1630 = shalt.err (!%p1627_p11)
}
  0x69   :  { %s2260_s29 = sld [smem:[#allocation43_spill]]  ;;  %s1639_s7 = scalar_lea.vmem %s74_s28, 16 }
  0x6a   :  { %p1640_p12 = scmp.ne.s32.totalorder %s74_s28, %s1639_s7  ;;  %s1643_s19 = scalar_lea.vmem %s74_s28, 32 }
  0x6b   :  { %p1644_p13 = scmp.lt.s32.totalorder %s74_s28, %s74_s28  ;;  %p1645_p0 = scmp.lt.s32.totalorder %s1643_s19, %s1639_s7 }
  0x6d   :  { %p1646_p1 = por %p1645_p0, %p1644_p13 }
  0x6f   :  { %52 = dma.hbm_to_vmem [thread:$0]  %s2260_s29, 32, %s50_s27, [#allocation4]  }
  0x70   :  { %p1647_p2 = pnand %p1646_p1, %p1640_p12 }
  0x72   :  { %1650 = shalt.err (!%p1647_p2)
}
  0x73   :  { %s2261_s13 = sld [smem:[#allocation47_spill]]  ;;  %s1864_s6 = smov [#allocation11]  }
  0x74   :  { %s97_s2 = sshll.u32 %s1864_s6, 4  ;;  %s1865_s3 = smov [#allocation14]   ;;  %s98_s2 = int_to_ptr.vmem [resolvable:$true] %s97_s2 }
  0x75   :  { %s121_s26 = sshll.u32 %s1865_s3, 4  ;;  %s1659_s1 = scalar_lea.vmem %s98_s2, 16  ;;  %s122_s26 = int_to_ptr.vmem [resolvable:$true] %s121_s26 }
  0x76   :  { %p1660_p3 = scmp.ne.s32.totalorder %s98_s2, %s1659_s1  ;;  %s1663_s15 = scalar_lea.vmem %s98_s2, 32 }
  0x77   :  { %p1664_p4 = scmp.lt.s32.totalorder %s98_s2, %s98_s2  ;;  %p1665_p5 = scmp.lt.s32.totalorder %s1663_s15, %s1659_s1 }
  0x79   :  { %76 = dma.hbm_to_vmem [thread:$0]  %s2261_s13, 16, %s74_s28, [#allocation7]  }
  0x7a   :  { %p1666_p6 = por %p1665_p5, %p1664_p4 }
  0x7c   :  { %p1667_p7 = pnand %p1666_p6, %p1660_p3 }
  0x7e   :  { %1670 = shalt.err (!%p1667_p7)
}
  0x7f   :  { %s2262_s27 = sld [smem:[#allocation51_spill]]  ;;  %s1679_s4 = scalar_lea.vmem %s122_s26, 16 }
  0x80   :  { %p1680_p8 = scmp.ne.s32.totalorder %s122_s26, %s1679_s4  ;;  %s1683_s28 = scalar_lea.vmem %s122_s26, 32 }
  0x81   :  { %p1684_p9 = scmp.lt.s32.totalorder %s122_s26, %s122_s26  ;;  %p1685_p10 = scmp.lt.s32.totalorder %s1683_s28, %s1679_s4 }
  0x83   :  { %p1686_p11 = por %p1685_p10, %p1684_p9 }
  0x85   :  { %100 = dma.hbm_to_vmem [thread:$0]  %s2262_s27, 16, %s98_s2, [#allocation10]  }
  0x86   :  { %p1687_p12 = pnand %p1686_p11, %p1680_p8 }
  0x88   :  { %1690 = shalt.err (!%p1687_p12)
}
  0x89   :  { %124 = dma.hbm_to_vmem [thread:$0]  %s2230_s12, 16, %s122_s26, [#allocation13]  }
  0x8a   :  { %s1866_s0 = smov [#allocation17]   ;;  %s1867_s7 = smov [#allocation20]  }
  0x8b   :  { %s141_s29 = sshll.u32 %s1866_s0, 4  ;;  %s163_s19 = sshll.u32 %s1867_s7, 4  ;;  %s142_s29 = int_to_ptr.vmem [resolvable:$true] %s141_s29  ;;  %s164_s19 = int_to_ptr.vmem [resolvable:$true] %s163_s19 }
  0x8c   :  { %s1699_s10 = scalar_lea.vmem %s142_s29, 16  ;;  %s1703_s9 = scalar_lea.vmem %s142_s29, 32 }
  0x8d   :  { %p1700_p13 = scmp.ne.s32.totalorder %s142_s29, %s1699_s10  ;;  %p1704_p0 = scmp.lt.s32.totalorder %s142_s29, %s142_s29 }
  0x8e   :  { %p1705_p1 = scmp.lt.s32.totalorder %s1703_s9, %s1699_s10 }
  0x90   :  { %p1706_p2 = por %p1705_p1, %p1704_p0 }
  0x92   :  { %p1707_p3 = pnand %p1706_p2, %p1700_p13 }
  0x94   :  { %1710 = shalt.err (!%p1707_p3)
}
  0x95   :  { %144 = dma.hbm_to_vmem [thread:$0]  %s2232_s14, 16, %s142_s29, [#allocation16]  }
  0x96   :  { %s1719_s2 = scalar_lea.vmem %s164_s19, 16  ;;  %s1723_s12 = scalar_lea.vmem %s164_s19, 32 }
  0x97   :  { %p1720_p4 = scmp.ne.s32.totalorder %s164_s19, %s1719_s2  ;;  %p1724_p5 = scmp.lt.s32.totalorder %s164_s19, %s164_s19 }
  0x98   :  { %p1725_p6 = scmp.lt.s32.totalorder %s1723_s12, %s1719_s2 }
  0x9a   :  { %p1726_p7 = por %p1725_p6, %p1724_p5 }
  0x9c   :  { %p1727_p8 = pnand %p1726_p7, %p1720_p4 }
  0x9e   :  { %1730 = shalt.err (!%p1727_p8)
}
  0x9f   :  { %166 = dma.hbm_to_vmem [thread:$0]  %s2234_s16, 16, %s164_s19, [#allocation19]  }
  0xa0   :  { %s1868_s1 = smov [#allocation23]   ;;  %s1869_s30 = smov [#allocation26]  }
  0xa1   :  { %s185_s15 = sshll.u32 %s1868_s1, 4  ;;  %s207_s8 = sshll.u32 %s1869_s30, 4  ;;  %s186_s15 = int_to_ptr.vmem [resolvable:$true] %s185_s15  ;;  %s208_s8 = int_to_ptr.vmem [resolvable:$true] %s207_s8 }
  0xa2   :  { %s1739_s27 = scalar_lea.vmem %s186_s15, 16  ;;  %s1743_s14 = scalar_lea.vmem %s186_s15, 32 }
  0xa3   :  { %p1740_p9 = scmp.ne.s32.totalorder %s186_s15, %s1739_s27  ;;  %p1744_p10 = scmp.lt.s32.totalorder %s186_s15, %s186_s15 }
  0xa4   :  { %p1745_p11 = scmp.lt.s32.totalorder %s1743_s14, %s1739_s27 }
  0xa6   :  { %p1746_p12 = por %p1745_p11, %p1744_p10 }
  0xa8   :  { %p1747_p13 = pnand %p1746_p12, %p1740_p9 }
  0xaa   :  { %1750 = shalt.err (!%p1747_p13)
}
  0xab   :  { %188 = dma.hbm_to_vmem [thread:$0]  %s2236_s18, 16, %s186_s15, [#allocation22]  }
  0xac   :  { %s1759_s5 = scalar_lea.vmem %s208_s8, 16  ;;  %s1763_s16 = scalar_lea.vmem %s208_s8, 32 }
  0xad   :  { %p1760_p0 = scmp.ne.s32.totalorder %s208_s8, %s1759_s5  ;;  %p1764_p1 = scmp.lt.s32.totalorder %s208_s8, %s208_s8 }
  0xae   :  { %p1765_p2 = scmp.lt.s32.totalorder %s1763_s16, %s1759_s5 }
  0xb0   :  { %p1766_p3 = por %p1765_p2, %p1764_p1 }
  0xb2   :  { %p1767_p4 = pnand %p1766_p3, %p1760_p0 }
  0xb4   :  { %1770 = shalt.err (!%p1767_p4)
}
  0xb5   :  { %210 = dma.hbm_to_vmem [thread:$0]  %s2238_s20, 16, %s208_s8, [#allocation25]  }
  0xb6   :  { %s1870_s29 = smov [#allocation27]  }
  0xb7   :  { %s219_s7 = sshll.u32 %s1870_s29, 4  ;;  %s220_s7 = int_to_ptr.vmem [resolvable:$true] %s219_s7 }
  0xb8   :  { %s1779_s19 = scalar_lea.vmem %s220_s7, 16  ;;  %s1783_s10 = scalar_lea.vmem %s220_s7, 32 }
  0xb9   :  { %p1780_p5 = scmp.ne.s32.totalorder %s220_s7, %s1779_s19  ;;  %p1784_p6 = scmp.lt.s32.totalorder %s220_s7, %s220_s7 }
  0xba   :  { %p1785_p7 = scmp.lt.s32.totalorder %s1783_s10, %s1779_s19 }
  0xbc   :  { %p1786_p8 = por %p1785_p7, %p1784_p6 }
  0xbe   :  { %p1787_p9 = pnand %p1786_p8, %p1780_p5 }
  0xc0   :  { %1790 = shalt.err (!%p1787_p9)
}
  0xc1   :  { %222 = dma.hbm_to_vmem [thread:$0]  %s2240_s22, 16, %s220_s7, [#allocation28]  }
  0xc2   :  { %1831 = dma.done.wait [#allocation4], 32  }
  0xc3   :  { %1832 = vsyncadd [#allocation4], 4294967264 }
  0xc4   :  { %1833 = dma.done.wait [#allocation7], 80  }
  0xc5   :  { %1834 = vsyncadd [#allocation7], 4294967216 }
  0xc6   :  { %1835 = dma.done.wait [#allocation10], 32  }
  0xc7   :  { %1836 = vsyncadd [#allocation10], 4294967264 }
  0xc8   :  { %1837 = dma.done.wait [#allocation13], 32  }
  0xc9   :  { %1838 = vsyncadd [#allocation13], 4294967264 }
  0xca   :  { %1839 = dma.done.wait [#allocation16], 48  }
  0xcb   :  { %1840 = vsyncadd [#allocation16], 4294967248 }
  0xcc   :  { %1841 = dma.done.wait [#allocation19], 144  }
  0xcd   :  { %1842 = vsyncadd [#allocation19], 4294967152 }
  0xce   :  { %1843 = dma.done.wait [#allocation22], 272  }
  0xcf   :  { %1844 = vsyncadd [#allocation22], 4294967024 }
  0xd0   :  { %1845 = dma.done.wait [#allocation25], 528  }
  0xd1   :  { %1846 = vsyncadd [#allocation25], 4294966768 }
  0xd2   :  { %1847 = dma.done.wait [#allocation28], 16  }
  0xd3   :  { %1848 = vsyncadd [#allocation28], 4294967280  ;;  %v1871_v0 = vmov 0.0   ;;  %vm1872_vm0 = vmmov 0   ;;  %s2263_s13 = sld [smem:[#allocation44_spill]]  ;;  %vm307_vm1 = vcmask 523264  }
  0xd4   :  { %1283 = vmatprep.subr.bf16.mxu0 %v1871_v0  ;;  %1291 = vmatprep.mubr.msk.bf16.mxu0 %vm1872_vm0, %v1871_v0  ;;  %v273_v5 = vld [vmem:[#allocation3] sm:$0x3]  ;;  %s2264_s8 = sld [smem:[#allocation45_spill]]  ;;  %vm353_vm2 = vcmask 58368   ;;  %v366_v19 = vld [vmem:[#allocation6] sm:$0xf] }
  0xd5   :  { %1295 = vmatprep.subr.bf16.mxu1 %v1871_v0  ;;  %1297 = vmatprep.mubr.msk.bf16.mxu1 %vm1872_vm0, %v1871_v0  ;;  %v274_v6 = vpack.c.bf16 %v273_v5, %v273_v5  ;;  %vm379_vm3 = vcmask 1043456   ;;  %vm375_vm4 = vcmask 64512   ;;  %s2265_s28 = sld [smem:[#allocation48_spill]]  ;;  %v1188_v33 = vld [vmem:[#allocation8] ss:$0 sm:$0xff]  ;;  %vm645_vm5 = vcmask 261120  }
  0xd6   :  { %v381_v20 = vsel %vm379_vm3, %v366_v19, 0  ;;  %s2266_s3 = sld [smem:[#allocation50_spill]]  ;;  %v1190_v45 = vld [vmem:[#allocation9] ss:$0 sm:$0xff]  ;;  %v1199_v55 = vld [vmem:[#allocation11] ss:$0 sm:$0xff] }
  0xd7   :  { %1296 = vmatpush3.bf16.msra.mxu1 %v381_v20  ;;  %s2267_s4 = sld [smem:[#allocation52_spill]]  ;;  %v1439_v63 = vld [vmem:[%s2229_s11] sm:$0xff]   ;;  %vm763_vm6 = vcmask 1041408   ;;  %vm706_vm7 = vcmask 130048   ;;  %vm1129_vm8 = vcmask 25600   ;;  %vm759_vm9 = vcmask 31744  }
  0xd8   :  { %1301 = vmatprep.subr.bf16.mxu1 %v1871_v0  ;;  %v1440_v19 = vld [vmem:[#allocation18] sm:$0xff]   ;;  %s1873_s1 = smov [#allocation30]  }
  0xd9   :  { %v1421_v1 = vld [vmem:[%s2263_s13 + $0x18] sm:$0xff]   ;;  %v1422_v2 = vld [vmem:[%s2263_s13 + $0x10] sm:$0xff]   ;;  %v1423_v3 = vld [vmem:[%s2263_s13 + $0x8] sm:$0xff]   ;;  %s1160_s15 = sshll.u32 %s1873_s1, 4  ;;  %s1161_s15 = int_to_ptr.vmem [resolvable:$true] %s1160_s15 }
  0xda   :  { %1284 = vmatpush3.bf16.msra.mxu0 %v1421_v1  ;;  %v1424_v4 = vld [vmem:[%s2263_s13] sm:$0xff]   ;;  %v351_v7 = vstv %s2264_s8  ;;  %v751_v1 = vld [vmem:[#allocation15] sm:$0x3]  ;;  %s1791_s30 = scalar_lea.vmem %s1161_s15, 32  ;;  %p1796_p11 = scmp.lt.s32.totalorder %s1161_s15, %s1161_s15 }
  0xdb   :  { %1285 = vmatprep.subr.bf16.mxu0 %v1871_v0  ;;  %v1425_v24 = vld [vmem:[%s2265_s28 + $0x38] sm:$0xff]   ;;  %v1426_v26 = vld [vmem:[%s2265_s28 + $0x30] sm:$0xff]   ;;  %v1427_v27 = vld [vmem:[%s2265_s28 + $0x28] sm:$0xff]   ;;  %p1792_p10 = scmp.ne.s32.totalorder %s1161_s15, %s1791_s30  ;;  %p1797_p12 = scmp.lt.s32.totalorder %s1791_s30, %s1791_s30 }
  0xdc   :  { %v1428_v28 = vld [vmem:[%s2265_s28 + $0x20] sm:$0xff]   ;;  %v1429_v29 = vld [vmem:[%s2265_s28 + $0x18] sm:$0xff]   ;;  %v1430_v30 = vld [vmem:[%s2265_s28 + $0x10] sm:$0xff]  }
  0xdd   :  { %v1431_v31 = vld [vmem:[%s2265_s28 + $0x8] sm:$0xff]   ;;  %v1432_v32 = vld [vmem:[%s2265_s28] sm:$0xff]   ;;  %v1433_v41 = vld [vmem:[%s2266_s3 + $0x18] sm:$0xff]   ;;  %p1798_p13 = por %p1797_p12, %p1796_p11 }
  0xde   :  { %1286 = vmatpush3.bf16.msra.mxu0 %v1422_v2  ;;  %v1434_v42 = vld [vmem:[%s2266_s3 + $0x10] sm:$0xff]   ;;  %v1435_v43 = vld [vmem:[%s2266_s3 + $0x8] sm:$0xff]   ;;  %v1436_v44 = vld [vmem:[%s2266_s3] sm:$0xff]   ;;  %v765_v2 = vsel %vm763_vm6, %v751_v1, 0 }
  0xdf   :  { %1287 = vmatprep.subr.bf16.mxu0 %v1871_v0  ;;  %v1437_v53 = vld [vmem:[%s2267_s4 + $0x8] sm:$0xff]   ;;  %v1438_v54 = vld [vmem:[%s2267_s4] sm:$0xff]   ;;  %p1799_p0 = pnand %p1798_p13, %p1792_p10 }
  0xe2   :  { %1288 = vmatpush3.bf16.msra.mxu0 %v1423_v3  ;;  %v1205_v3 = vld [vmem:[#allocation12] ss:$0 sm:$0xff] }
  0xe3   :  { %1289 = vmatprep.subr.bf16.mxu0 %v1871_v0 }
  0xe6   :  { %1290 = vmatpush3.bf16.msra.mxu0 %v1424_v4 }
  0xe7   :  { %1321 = vmatprep.subr.bf16.mxu0 %v1871_v0 }
  0xe9   :  { %1292 = vmatmul.mubr.msk.bf16.vlgmr.msra.gmra.mxu0 %vm307_vm1, %v274_v6 }
  0xea   :  { %1329 = vmatprep.mubr.msk.bf16.mxu0 %vm1872_vm0, %v1871_v0  ;;  %1322 = vmatpush3.bf16.msra.mxu0 %v1433_v41 }
  0xeb   :  { %1323 = vmatprep.subr.bf16.mxu0 %v1871_v0 }
  0xee   :  { %1324 = vmatpush3.bf16.msra.mxu0 %v1434_v42 }
  0xef   :  { %1325 = vmatprep.subr.bf16.mxu0 %v1871_v0 }
  0xf2   :  { %1326 = vmatpush3.bf16.msra.mxu0 %v1435_v43 }
  0xf3   :  { %1327 = vmatprep.subr.bf16.mxu0 %v1871_v0 }
  0xf6   :  { %1328 = vmatpush3.bf16.msra.mxu0 %v1436_v44 }
  0xf7   :  { %1347 = vmatprep.subr.bf16.mxu0 %v1871_v0 }
 0x1a9   :  { %v345_v8 = vpop.f32.mrf.mxu0 }
 0x1aa   :  { %v352_v9 = vmul.f32 %v351_v7, %v345_v8 }
 0x1ab   :  { %v1293_v10 = vpop.f32.mrf.mxu0 }
 0x1ac   :  { %v355_v11 = vsel %vm353_vm2, %v352_v9, -inf  ;;  %354 = vst.msk [vmem:[%s2241_s23] sm:$0x3] %vm353_vm2, %v352_v9 }
 0x1ad   :  { %356 = vmax.xlane.f32.xlu0 %v355_v11  ;;  %v348_v12 = vpop.f32.mrf.mxu0  ;;  %v1209_v11 = vld [vmem:[#allocation14] ss:$0 sm:$0xff] }
 0x1af   :  { %v1294_v13 = vpop.f32.mrf.mxu0 }
 0x236   :  { %v357_v14 = vpop.xlane.xlu0 %356 }
 0x237   :  { %v358_v15 = vsub.f32 %v352_v9, %v357_v14 }
 0x239   :  { %v359_v16 = vmul.f32 1.442695, %v358_v15 }
 0x23b   :  { %1455 = vpow2.f32 %v359_v16 }
 0x248   :  { %v1456_v17 = vpop.eup %1455 }
 0x249   :  { %v361_v18 = vsel %vm353_vm2, %v1456_v17, 0.0 }
 0x24a   :  { %362 = vadd.xlane.f32.xlu0 %v361_v18 }
 0x2d3   :  { %v363_v21 = vpop.xlane.xlu0 %362 }
 0x2d4   :  { %1457 = vrcp.f32 %v363_v21 }
 0x2e1   :  { %v1458_v22 = vpop.eup %1457 }
 0x2e2   :  { %v365_v23 = vmul.f32 %v1458_v22, %v1456_v17 }
 0x2e4   :  { %v368_v25 = vpack.c.bf16 %v365_v23, %v365_v23 }
 0x2e6   :  { %1298 = vmatmul.mubr.msk.bf16.vlgmr.msra.gmra.mxu1 %vm375_vm4, %v368_v25  ;;  %v1441_v25 = vld [vmem:[#allocation21 + $0x8] sm:$0xff]  }
 0x2e7   :  { %1302 = vmatpush3.bf16.msra.mxu1 %v1425_v24  ;;  %1317 = vmatprep.mubr.msk.bf16.mxu1 %vm1872_vm0, %v1871_v0 }
 0x2e8   :  { %1303 = vmatprep.subr.bf16.mxu1 %v1871_v0 }
 0x2eb   :  { %1304 = vmatpush3.bf16.msra.mxu1 %v1426_v26  ;;  %v1212_v26 = vld [vmem:[#allocation17] ss:$0 sm:$0xff] }
 0x2ec   :  { %1305 = vmatprep.subr.bf16.mxu1 %v1871_v0 }
 0x2ef   :  { %1306 = vmatpush3.bf16.msra.mxu1 %v1427_v27 }
 0x2f0   :  { %1307 = vmatprep.subr.bf16.mxu1 %v1871_v0 }
 0x2f3   :  { %1308 = vmatpush3.bf16.msra.mxu1 %v1428_v28 }
 0x2f4   :  { %1309 = vmatprep.subr.bf16.mxu1 %v1871_v0 }
 0x2f7   :  { %1310 = vmatpush3.bf16.msra.mxu1 %v1429_v29 }
 0x2f8   :  { %1311 = vmatprep.subr.bf16.mxu1 %v1871_v0 }
 0x2fb   :  { %1312 = vmatpush3.bf16.msra.mxu1 %v1430_v30 }
 0x2fc   :  { %1313 = vmatprep.subr.bf16.mxu1 %v1871_v0 }
 0x2ff   :  { %1314 = vmatpush3.bf16.msra.mxu1 %v1431_v31 }
 0x300   :  { %1315 = vmatprep.subr.bf16.mxu1 %v1871_v0 }
 0x303   :  { %1316 = vmatpush3.bf16.msra.mxu1 %v1432_v32 }
 0x304   :  { %1333 = vmatprep.subr.bf16.mxu1 %v1871_v0 }
 0x3a6   :  { %v417_v34 = vpop.f32.mrf.mxu1 }
 0x3a7   :  { %v418_v35 = vadd.f32 %v1188_v33, %v417_v34  ;;  %v1442_v33 = vld [vmem:[#allocation21] sm:$0xff]   ;;  %v1443_v34 = vld [vmem:[#allocation24 + $0x18] sm:$0xff]  }
 0x3a8   :  { %v1299_v36 = vpop.f32.mrf.mxu1 }
 0x3a9   :  { %1459 = vtanh.f32 %v418_v35  ;;  %v1444_v35 = vld [vmem:[#allocation24 + $0x10] sm:$0xff]   ;;  %v1445_v36 = vld [vmem:[#allocation24 + $0x8] sm:$0xff]  }
 0x3aa   :  { %v420_v37 = vpop.f32.mrf.mxu1 }
 0x3ac   :  { %v1300_v38 = vpop.f32.mrf.mxu1 }
 0x3b6   :  { %v1460_v39 = vpop.eup %1459 }
 0x3b7   :  { %v441_v40 = vpack.c.bf16 %v1460_v39, %v1460_v39 }
 0x3b9   :  { %1318 = vmatmul.mubr.bf16.vlgmr.msra.gmra.mxu1 %v441_v40  ;;  %v1214_v40 = vld [vmem:[#allocation20] ss:$0 sm:$0xff] }
 0x3ba   :  { %1337 = vmatprep.mubr.msk.bf16.mxu1 %vm1872_vm0, %v1871_v0  ;;  %1334 = vmatpush3.bf16.msra.mxu1 %v1437_v53  ;;  %v1452_v53 = vld [vmem:[%s2239_s21 + $0x10] sm:$0xff]  }
 0x3bb   :  { %1335 = vmatprep.subr.bf16.mxu1 %v1871_v0 }
 0x3be   :  { %1336 = vmatpush3.bf16.msra.mxu1 %v1438_v54  ;;  %v1453_v54 = vld [vmem:[%s2239_s21 + $0x8] sm:$0xff]  }
 0x3bf   :  { %1341 = vmatprep.subr.bf16.mxu1 %v1871_v0 }
 0x479   :  { %v530_v46 = vpop.f32.mrf.mxu1 }
 0x47a   :  { %v531_v47 = vadd.f32 %v1190_v45, %v530_v46 }
 0x47b   :  { %v1319_v48 = vpop.f32.mrf.mxu1 }
 0x47c   :  { %1461 = vtanh.f32 %v531_v47  ;;  %v1446_v47 = vld [vmem:[#allocation24] sm:$0xff]   ;;  %v1447_v48 = vld [vmem:[%s2239_s21 + $0x38] sm:$0xff]  }
 0x47d   :  { %v533_v49 = vpop.f32.mrf.mxu1 }
 0x47e   :  { %v1448_v49 = vld [vmem:[%s2239_s21 + $0x30] sm:$0xff]  }
 0x47f   :  { %v1320_v50 = vpop.f32.mrf.mxu1 }
 0x480   :  { %v1449_v50 = vld [vmem:[%s2239_s21 + $0x28] sm:$0xff]  }
 0x489   :  { %v1462_v51 = vpop.eup %1461 }
 0x48a   :  { %v546_v52 = vpack.c.bf16 %v1462_v51, %v1462_v51  ;;  %v1450_v51 = vld [vmem:[%s2239_s21 + $0x20] sm:$0xff]  }
 0x48c   :  { %1330 = vmatmul.mubr.msk.bf16.vlgmr.msra.gmra.mxu0 %vm307_vm1, %v546_v52  ;;  %v1451_v52 = vld [vmem:[%s2239_s21 + $0x18] sm:$0xff]  }
 0x48d   :  { %1349 = vmatprep.mubr.msk.bf16.mxu0 %vm1872_vm0, %v1871_v0  ;;  %1348 = vmatpush3.bf16.msra.mxu0 %v765_v2 }
 0x48e   :  { %1359 = vmatprep.subr.bf16.mxu0 %v1871_v0 }
 0x54c   :  { %v614_v56 = vpop.f32.mrf.mxu0 }
 0x54d   :  { %v615_v57 = vadd.f32 %v1199_v55, %v614_v56  ;;  %v1217_v55 = vld [vmem:[#allocation23] ss:$0 sm:$0xff] }
 0x54e   :  { %v1331_v58 = vpop.f32.mrf.mxu0 }
 0x54f   :  { %1463 = vtanh.f32 %v615_v57 }
 0x550   :  { %v617_v59 = vpop.f32.mrf.mxu0 }
 0x552   :  { %v1332_v60 = vpop.f32.mrf.mxu0 }
 0x55c   :  { %v1464_v61 = vpop.eup %1463 }
 0x55d   :  { %v626_v62 = vpack.c.bf16 %v1464_v61, %v1464_v61 }
 0x55f   :  { %1338 = vmatmul.mubr.msk.bf16.vlgmr.msra.gmra.mxu1 %vm645_vm5, %v626_v62  ;;  %v1454_v62 = vld [vmem:[%s2239_s21] sm:$0xff]  }
 0x560   :  { %1343 = vmatprep.mubr.msk.bf16.mxu1 %vm1872_vm0, %v1871_v0  ;;  %1342 = vmatpush3.bf16.msra.mxu1 %v1439_v63  ;;  %v1221_v63 = vld [vmem:[#allocation26] ss:$0 sm:$0xff] }
 0x561   :  { %1353 = vmatprep.subr.bf16.mxu1 %v1871_v0 }
 0x61f   :  { %v683_v4 = vpop.f32.mrf.mxu1 }
 0x620   :  { %v684_v5 = vadd.f32 %v1205_v3, %v683_v4 }
 0x621   :  { %v1339_v6 = vpop.f32.mrf.mxu1 }
 0x622   :  { %1465 = vtanh.f32 %v684_v5 }
 0x623   :  { %v686_v7 = vpop.f32.mrf.mxu1 }
 0x625   :  { %v1340_v8 = vpop.f32.mrf.mxu1 }
 0x62f   :  { %v1466_v9 = vpop.eup %1465 }
 0x630   :  { %v693_v10 = vpack.c.bf16 %v1466_v9, %v1466_v9 }
 0x632   :  { %1344 = vmatmul.mubr.msk.bf16.vlgmr.msra.gmra.mxu1 %vm706_vm7, %v693_v10 }
 0x633   :  { %1355 = vmatprep.mubr.msk.bf16.mxu1 %vm1872_vm0, %v1871_v0  ;;  %1354 = vmatpush3.bf16.msra.mxu1 %v1440_v19 }
 0x634   :  { %1367 = vmatprep.subr.bf16.mxu1 %v1871_v0 }
 0x6f2   :  { %v744_v12 = vpop.f32.mrf.mxu1 }
 0x6f3   :  { %v745_v13 = vadd.f32 %v1209_v11, %v744_v12 }
 0x6f4   :  { %v1345_v14 = vpop.f32.mrf.mxu1 }
 0x6f5   :  { %v750_v15 = vpack.c.bf16 %v745_v13, %v745_v13  ;;  %v1130_v16 = vsel %vm1129_vm8, %v745_v13, -inf }
 0x6f6   :  { %1131 = vmax.xlane.f32.xlu1 %v1130_v16  ;;  %v747_v17 = vpop.f32.mrf.mxu1 }
 0x6f7   :  { %1350 = vmatmul.mubr.msk.bf16.vlgmr.msra.gmra.mxu0 %vm759_vm9, %v750_v15 }
 0x6f8   :  { %v1346_v18 = vpop.f32.mrf.mxu1  ;;  %1363 = vmatprep.mubr.msk.bf16.mxu0 %vm1872_vm0, %v1871_v0  ;;  %1360 = vmatpush3.bf16.msra.mxu0 %v1441_v25 }
 0x6f9   :  { %1361 = vmatprep.subr.bf16.mxu0 %v1871_v0 }
 0x6fc   :  { %1362 = vmatpush3.bf16.msra.mxu0 %v1442_v33 }
 0x6fd   :  { %1379 = vmatprep.subr.bf16.mxu0 %v1871_v0 }
 0x77f   :  { %v1132_v20 = vpop.xlane.xlu1 %1131 }
 0x780   :  { %v1133_v21 = vsub.f32 %v745_v13, %v1132_v20 }
 0x782   :  { %v1134_v22 = vmul.f32 1.442695, %v1133_v21 }
 0x784   :  { %1467 = vpow2.f32 %v1134_v22 }
 0x791   :  { %v1468_v23 = vpop.eup %1467 }
 0x792   :  { %v1136_v24 = vsel %vm1129_vm8, %v1468_v23, 0.0 }
 0x793   :  { %1137 = vadd.xlane.f32.xlu1 %v1136_v24 }
 0x7b7   :  { %v801_v27 = vpop.f32.mrf.mxu0 }
 0x7b8   :  { %v802_v28 = vadd.f32 %v1212_v26, %v801_v27 }
 0x7b9   :  { %v1351_v29 = vpop.f32.mrf.mxu0 }
 0x7ba   :  { %v807_v30 = vpack.c.bf16 %v802_v28, %v802_v28 }
 0x7bb   :  { %v804_v31 = vpop.f32.mrf.mxu0 }
 0x7bc   :  { %1356 = vmatmul.mubr.msk.bf16.vlgmr.msra.gmra.mxu1 %vm706_vm7, %v807_v30 }
 0x7bd   :  { %v1352_v32 = vpop.f32.mrf.mxu0  ;;  %1375 = vmatprep.mubr.msk.bf16.mxu1 %vm1872_vm0, %v1871_v0  ;;  %1368 = vmatpush3.bf16.msra.mxu1 %v1443_v34 }
 0x7be   :  { %1369 = vmatprep.subr.bf16.mxu1 %v1871_v0 }
 0x7c1   :  { %1370 = vmatpush3.bf16.msra.mxu1 %v1444_v35 }
 0x7c2   :  { %1371 = vmatprep.subr.bf16.mxu1 %v1871_v0 }
 0x7c5   :  { %1372 = vmatpush3.bf16.msra.mxu1 %v1445_v36 }
 0x7c6   :  { %1373 = vmatprep.subr.bf16.mxu1 %v1871_v0 }
 0x7c9   :  { %1374 = vmatpush3.bf16.msra.mxu1 %v1446_v47 }
 0x81c   :  { %v1138_v37 = vpop.xlane.xlu1 %1137 }
 0x81d   :  { %1469 = vrcp.f32 %v1138_v37 }
 0x82a   :  { %v1470_v38 = vpop.eup %1469 }
 0x82b   :  { %v1140_v39 = vmul.f32 %v1470_v38, %v1468_v23 }
 0x82d   :  { %1141 = vst.msk [vmem:[#allocation30] sm:$0x3] %vm1129_vm8, %v1140_v39 }
 0x87c   :  { %v860_v41 = vpop.f32.mrf.mxu1 }
 0x87d   :  { %v861_v42 = vadd.f32 %v1214_v40, %v860_v41 }
 0x87e   :  { %v1357_v43 = vpop.f32.mrf.mxu1 }
 0x87f   :  { %v866_v44 = vpack.c.bf16 %v861_v42, %v861_v42 }
 0x880   :  { %v863_v45 = vpop.f32.mrf.mxu1 }
 0x881   :  { %1364 = vmatmul.mubr.msk.bf16.vlgmr.msra.gmra.mxu0 %vm645_vm5, %v866_v44 }
 0x882   :  { %v1358_v46 = vpop.f32.mrf.mxu1  ;;  %1395 = vmatprep.mubr.msk.bf16.mxu0 %vm1872_vm0, %v1871_v0  ;;  %1380 = vmatpush3.bf16.msra.mxu0 %v1447_v48 }
 0x883   :  { %1381 = vmatprep.subr.bf16.mxu0 %v1871_v0 }
 0x886   :  { %1382 = vmatpush3.bf16.msra.mxu0 %v1448_v49 }
 0x887   :  { %1383 = vmatprep.subr.bf16.mxu0 %v1871_v0 }
 0x88a   :  { %1384 = vmatpush3.bf16.msra.mxu0 %v1449_v50 }
 0x88b   :  { %1385 = vmatprep.subr.bf16.mxu0 %v1871_v0 }
 0x88e   :  { %1386 = vmatpush3.bf16.msra.mxu0 %v1450_v51 }
 0x88f   :  { %1387 = vmatprep.subr.bf16.mxu0 %v1871_v0 }
 0x892   :  { %1388 = vmatpush3.bf16.msra.mxu0 %v1451_v52 }
 0x893   :  { %1389 = vmatprep.subr.bf16.mxu0 %v1871_v0 }
 0x896   :  { %1390 = vmatpush3.bf16.msra.mxu0 %v1452_v53 }
 0x897   :  { %1391 = vmatprep.subr.bf16.mxu0 %v1871_v0 }
 0x89a   :  { %1392 = vmatpush3.bf16.msra.mxu0 %v1453_v54 }
 0x89b   :  { %1393 = vmatprep.subr.bf16.mxu0 %v1871_v0 }
 0x89e   :  { %1394 = vmatpush3.bf16.msra.mxu0 %v1454_v62 }
 0x941   :  { %v927_v56 = vpop.f32.mrf.mxu0 }
 0x942   :  { %v928_v57 = vadd.f32 %v1217_v55, %v927_v56 }
 0x943   :  { %v1365_v58 = vpop.f32.mrf.mxu0 }
 0x944   :  { %v933_v59 = vpack.c.bf16 %v928_v57, %v928_v57 }
 0x945   :  { %v930_v60 = vpop.f32.mrf.mxu0 }
 0x946   :  { %1376 = vmatmul.mubr.msk.bf16.vlgmr.msra.gmra.mxu1 %vm307_vm1, %v933_v59 }
 0x947   :  { %v1366_v61 = vpop.f32.mrf.mxu0 }
 0xa06   :  { %v1010_v1 = vpop.f32.mrf.mxu1 }
 0xa07   :  { %v1011_v2 = vadd.f32 %v1221_v63, %v1010_v1 }
 0xa08   :  { %v1377_v3 = vpop.f32.mrf.mxu1 }
 0xa09   :  { %v1016_v4 = vpack.c.bf16 %v1011_v2, %v1011_v2 }
 0xa0a   :  { %v1013_v0 = vpop.f32.mrf.mxu1 }
 0xa0b   :  { %1396 = vmatmul.mubr.bf16.vlgmr.msra.gmra.mxu0 %v1016_v4 }
 0xa0c   :  { %v1378_v5 = vpop.f32.mrf.mxu1 }
 0xa0d   :  { %1802 = shalt.err (!%p1799_p0)
}
 0xa0e   :  { %1163 = dma.vmem_to_hbm [thread:$0]  %s1161_s15, 32, %s2243_s25, [#allocation31]   ;;  %v1227_v6 = vld [vmem:[#allocation27] ss:$0 sm:$0xff] }
 0xa0f   :  { %s1874_s27 = smov [#allocation29]  }
 0xa10   :  { %s1150_s14 = sshll.u32 %s1874_s27, 4  ;;  %s1151_s14 = int_to_ptr.vmem [resolvable:$true] %s1150_s14 }
 0xa11   :  { %s1811_s23 = scalar_lea.vmem %s1151_s14, 32  ;;  %p1816_p2 = scmp.lt.s32.totalorder %s1151_s14, %s1151_s14 }
 0xa12   :  { %p1812_p1 = scmp.ne.s32.totalorder %s1151_s14, %s1811_s23  ;;  %p1817_p3 = scmp.lt.s32.totalorder %s1811_s23, %s1811_s23 }
 0xa14   :  { %p1818_p4 = por %p1817_p3, %p1816_p2 }
 0xa16   :  { %p1819_p5 = pnand %p1818_p4, %p1812_p1 }
 0xacb   :  { %v1122_v7 = vpop.f32.mrf.mxu0 }
 0xacc   :  { %v1123_v8 = vadd.f32 %v1227_v6, %v1122_v7 }
 0xacd   :  { %v1397_v9 = vpop.f32.mrf.mxu0 }
 0xace   :  { %1128 = vst.msk [vmem:[#allocation29] sm:$0x3] %vm353_vm2, %v1123_v8 }
 0xacf   :  { %v1125_v10 = vpop.f32.mrf.mxu0 }
 0xad0   :  { %1822 = shalt.err (!%p1819_p5)
}
 0xad1   :  { %1153 = dma.vmem_to_hbm [thread:$0]  %s1151_s14, 32, %s2242_s24, [#allocation5]   ;;  %v1398_v11 = vpop.f32.mrf.mxu0 }
 0xad2   :  { %1849 = dma.done.wait [#allocation5], 32  }
 0xad3   :  { %1850 = vsyncadd [#allocation5], 4294967264 }
 0xad4   :  { %1851 = dma.done.wait [#allocation31], 32  }
 0xad5   :  { %1852 = vsyncadd [#allocation31], 4294967264 }
 0xad6   :  { %1172 = vsyncpa [#allocation4], 1 }
 0xad7   :  { %1173 = vsyncpa [#allocation7], 1 }
 0xad8   :  { %1174 = vsyncpa [#allocation10], 1 }
 0xad9   :  { %1175 = vsyncpa [#allocation13], 1 }
 0xada   :  { %1176 = vsyncpa [#allocation16], 1 }
 0xadb   :  { %1177 = vsyncpa [#allocation19], 1 }
 0xadc   :  { %1178 = vsyncpa [#allocation22], 1 }
 0xadd   :  { %1179 = vsyncpa [#allocation25], 1 }
 0xade   :  { %1180 = vsyncpa [#allocation28], 1 }
 0xadf   :  { %1181 = vsyncpa [#allocation5], 1 }
 0xae0   :  { %1182 = vsyncpa [#allocation31], 1 }

// kernel: classification_ae_forward.6
= control target key start
LH: loop header
LB: loop body
LE: loop exit
PB: predicated region body
PF: predicated region fallthrough
CT: control target
= control target key end

     0   :  { %v657_v1 = vmov 0   ;;  %vm175_vm0 = vcmask 130048   ;;  %s1047_s1 = inlined_call_operand.vmem [shape: bf16[16,256], index: 1, kind: input, shape index: {}]   ;;  %s1048_s0 = inlined_call_operand.vmem [shape: bf16[338,16], index: 0, kind: input, shape index: {}]   ;;  %s1049_s2 = inlined_call_operand.vmem [shape: f32[338,256], index: 2, kind: output, shape index: {}]  }
   0x1   :  { %v632_v0 = vld [vmem:[%s1047_s1 + $0x4] ss:$8 sps:$4 sm:$0xff]   ;;  %274 = vmatprep.mubr.bf16.mxu0 %v657_v1  ;;  %384 = vmatprep.mubr.bf16.mxu1 %v657_v1  ;;  %v634_v2 = vld [vmem:[%s1047_s1] ss:$8 sps:$4 sm:$0xff]   ;;  %v636_v4 = vld [vmem:[%s1048_s0 + $0x58] sm:$0xff]  }
   0x2   :  { %256 = vmatprep.subr.bf16.mxu0 %v632_v0  ;;  %629 = vmatprep.subr.bf16.mxu1 %v632_v0  ;;  %v635_v3 = vld [vmem:[%s1048_s0] sm:$0xff]   ;;  %v637_v5 = vld [vmem:[%s1048_s0 + $0x8] sm:$0xff]   ;;  %v639_v7 = vld [vmem:[%s1048_s0 + $0x10] sm:$0xff]  }
   0x3   :  { %257 = vmatpush1.bf16.msra.mxu0 %v634_v2  ;;  %630 = vmatpush1.bf16.msra.mxu1 %v634_v2  ;;  %v638_v6 = vld [vmem:[%s1048_s0 + $0x60] sm:$0xff]   ;;  %v640_v8 = vld [vmem:[%s1048_s0 + $0x68] sm:$0xff]   ;;  %v641_v9 = vld [vmem:[%s1048_s0 + $0x18] sm:$0xff]  }
   0x4   :  { %v642_v10 = vld [vmem:[%s1048_s0 + $0x70] sm:$0xff]   ;;  %v643_v11 = vld [vmem:[%s1048_s0 + $0x20] sm:$0xff]   ;;  %v644_v12 = vld [vmem:[%s1048_s0 + $0x78] sm:$0xff]  }
   0x5   :  { %v645_v13 = vld [vmem:[%s1048_s0 + $0x28] sm:$0xff]   ;;  %v646_v14 = vld [vmem:[%s1048_s0 + $0x80] sm:$0xff]   ;;  %v647_v15 = vld [vmem:[%s1048_s0 + $0x30] sm:$0xff]  }
   0x6   :  { %607 = vmatmul.mubr.msk.bf16.vlgmr.msra.gmra.mxu0 %vm175_vm0, %v635_v3  ;;  %618 = vmatmul.mubr.msk.bf16.vlgmr.msra.gmra.mxu1 %vm175_vm0, %v636_v4  ;;  %v648_v16 = vld [vmem:[%s1048_s0 + $0x88] sm:$0xff]   ;;  %v649_v17 = vld [vmem:[%s1048_s0 + $0x38] sm:$0xff]   ;;  %v650_v18 = vld [vmem:[%s1048_s0 + $0x90] sm:$0xff]  }
   0x7   :  { %284 = vmatprep.mubr.bf16.mxu0 %v657_v1  ;;  %394 = vmatprep.mubr.bf16.mxu1 %v657_v1  ;;  %v651_v19 = vld [vmem:[%s1048_s0 + $0x40] sm:$0xff]   ;;  %v652_v20 = vld [vmem:[%s1048_s0 + $0x98] sm:$0xff]   ;;  %v653_v21 = vld [vmem:[%s1048_s0 + $0x48] sm:$0xff]  }
   0x8   :  { %v654_v22 = vld [vmem:[%s1048_s0 + $0xa0] sm:$0xff]   ;;  %v655_v23 = vld [vmem:[%s1048_s0 + $0x50] sm:$0xff]   ;;  %v656_v24 = vld [vmem:[%s1048_s0 + $0xa8] ss:$0 sps:$4 sm:$0x11]  }
   0xe   :  { %608 = vmatmul.mubr.msk.bf16.gmra.mxu0 %vm175_vm0, %v637_v5  ;;  %619 = vmatmul.mubr.msk.bf16.gmra.mxu1 %vm175_vm0, %v638_v6 }
   0xf   :  { %294 = vmatprep.mubr.bf16.mxu0 %v657_v1  ;;  %404 = vmatprep.mubr.bf16.mxu1 %v657_v1 }
  0x16   :  { %609 = vmatmul.mubr.msk.bf16.gmra.mxu0 %vm175_vm0, %v639_v7  ;;  %620 = vmatmul.mubr.msk.bf16.gmra.mxu1 %vm175_vm0, %v640_v8 }
  0x17   :  { %304 = vmatprep.mubr.bf16.mxu0 %v657_v1  ;;  %414 = vmatprep.mubr.bf16.mxu1 %v657_v1 }
  0x1e   :  { %610 = vmatmul.mubr.msk.bf16.gmra.mxu0 %vm175_vm0, %v641_v9  ;;  %621 = vmatmul.mubr.msk.bf16.gmra.mxu1 %vm175_vm0, %v642_v10 }
  0x1f   :  { %314 = vmatprep.mubr.bf16.mxu0 %v657_v1  ;;  %424 = vmatprep.mubr.bf16.mxu1 %v657_v1 }
  0x26   :  { %611 = vmatmul.mubr.msk.bf16.gmra.mxu0 %vm175_vm0, %v643_v11  ;;  %622 = vmatmul.mubr.msk.bf16.gmra.mxu1 %vm175_vm0, %v644_v12 }
  0x27   :  { %324 = vmatprep.mubr.bf16.mxu0 %v657_v1  ;;  %434 = vmatprep.mubr.bf16.mxu1 %v657_v1 }
  0x2e   :  { %612 = vmatmul.mubr.msk.bf16.gmra.mxu0 %vm175_vm0, %v645_v13  ;;  %623 = vmatmul.mubr.msk.bf16.gmra.mxu1 %vm175_vm0, %v646_v14 }
  0x2f   :  { %334 = vmatprep.mubr.bf16.mxu0 %v657_v1  ;;  %444 = vmatprep.mubr.bf16.mxu1 %v657_v1 }
  0x36   :  { %613 = vmatmul.mubr.msk.bf16.gmra.mxu0 %vm175_vm0, %v647_v15  ;;  %624 = vmatmul.mubr.msk.bf16.gmra.mxu1 %vm175_vm0, %v648_v16 }
  0x37   :  { %344 = vmatprep.mubr.bf16.mxu0 %v657_v1  ;;  %454 = vmatprep.mubr.bf16.mxu1 %v657_v1 }
  0x3e   :  { %614 = vmatmul.mubr.msk.bf16.gmra.mxu0 %vm175_vm0, %v649_v17  ;;  %625 = vmatmul.mubr.msk.bf16.gmra.mxu1 %vm175_vm0, %v650_v18 }
  0x3f   :  { %354 = vmatprep.mubr.bf16.mxu0 %v657_v1  ;;  %464 = vmatprep.mubr.bf16.mxu1 %v657_v1 }
  0x46   :  { %615 = vmatmul.mubr.msk.bf16.gmra.mxu0 %vm175_vm0, %v651_v19  ;;  %626 = vmatmul.mubr.msk.bf16.gmra.mxu1 %vm175_vm0, %v652_v20 }
  0x47   :  { %364 = vmatprep.mubr.bf16.mxu0 %v657_v1  ;;  %474 = vmatprep.mubr.bf16.mxu1 %v657_v1 }
  0x4e   :  { %616 = vmatmul.mubr.msk.bf16.gmra.mxu0 %vm175_vm0, %v653_v21  ;;  %627 = vmatmul.mubr.msk.bf16.gmra.mxu1 %vm175_vm0, %v654_v22 }
  0x4f   :  { %374 = vmatprep.mubr.bf16.mxu0 %v657_v1  ;;  %484 = vmatprep.mubr.bf16.mxu1 %v657_v1 }
  0x56   :  { %617 = vmatmul.mubr.msk.bf16.gmra.mxu0 %vm175_vm0, %v655_v23  ;;  %628 = vmatmul.mubr.msk.bf16.gmra.mxu1 %vm175_vm0, %v656_v24 }
  0xc6   :  { %v276_v25 = vpop.f32.mrf.mxu0  ;;  %v386_v26 = vpop.f32.mrf.mxu1 }
  0xc7   :  { %493 = vst [vmem:[%s1049_s2] sm:$0xff] %v276_v25  ;;  %537 = vst [vmem:[%s1049_s2 + $0x160] sm:$0xff] %v386_v26 }
  0xc8   :  { %v278_v27 = vpop.f32.mrf.mxu0  ;;  %v388_v28 = vpop.f32.mrf.mxu1 }
  0xc9   :  { %494 = vst [vmem:[%s1049_s2 + $0x8] sm:$0xff] %v278_v27  ;;  %538 = vst [vmem:[%s1049_s2 + $0x168] sm:$0xff] %v388_v28 }
  0xca   :  { %v280_v29 = vpop.f32.mrf.mxu0  ;;  %v390_v30 = vpop.f32.mrf.mxu1 }
  0xcb   :  { %495 = vst [vmem:[%s1049_s2 + $0x10] sm:$0xff] %v280_v29  ;;  %539 = vst [vmem:[%s1049_s2 + $0x170] sm:$0xff] %v390_v30 }
  0xcc   :  { %v282_v31 = vpop.f32.mrf.mxu0  ;;  %v392_v32 = vpop.f32.mrf.mxu1 }
  0xcd   :  { %496 = vst [vmem:[%s1049_s2 + $0x18] sm:$0xff] %v282_v31  ;;  %540 = vst [vmem:[%s1049_s2 + $0x178] sm:$0xff] %v392_v32 }
  0xce   :  { %v286_v33 = vpop.f32.mrf.mxu0  ;;  %v396_v34 = vpop.f32.mrf.mxu1 }
  0xcf   :  { %497 = vst [vmem:[%s1049_s2 + $0x20] sm:$0xff] %v286_v33  ;;  %541 = vst [vmem:[%s1049_s2 + $0x180] sm:$0xff] %v396_v34 }
  0xd0   :  { %v288_v35 = vpop.f32.mrf.mxu0  ;;  %v398_v36 = vpop.f32.mrf.mxu1 }
  0xd1   :  { %498 = vst [vmem:[%s1049_s2 + $0x28] sm:$0xff] %v288_v35  ;;  %542 = vst [vmem:[%s1049_s2 + $0x188] sm:$0xff] %v398_v36 }
  0xd2   :  { %v290_v37 = vpop.f32.mrf.mxu0  ;;  %v400_v38 = vpop.f32.mrf.mxu1 }
  0xd3   :  { %499 = vst [vmem:[%s1049_s2 + $0x30] sm:$0xff] %v290_v37  ;;  %543 = vst [vmem:[%s1049_s2 + $0x190] sm:$0xff] %v400_v38 }
  0xd4   :  { %v292_v39 = vpop.f32.mrf.mxu0  ;;  %v402_v40 = vpop.f32.mrf.mxu1 }
  0xd5   :  { %500 = vst [vmem:[%s1049_s2 + $0x38] sm:$0xff] %v292_v39  ;;  %544 = vst [vmem:[%s1049_s2 + $0x198] sm:$0xff] %v402_v40 }
  0xd6   :  { %v296_v41 = vpop.f32.mrf.mxu0  ;;  %v406_v42 = vpop.f32.mrf.mxu1 }
  0xd7   :  { %501 = vst [vmem:[%s1049_s2 + $0x40] sm:$0xff] %v296_v41  ;;  %545 = vst [vmem:[%s1049_s2 + $0x1a0] sm:$0xff] %v406_v42 }
  0xd8   :  { %v298_v43 = vpop.f32.mrf.mxu0  ;;  %v408_v44 = vpop.f32.mrf.mxu1 }
  0xd9   :  { %502 = vst [vmem:[%s1049_s2 + $0x48] sm:$0xff] %v298_v43  ;;  %546 = vst [vmem:[%s1049_s2 + $0x1a8] sm:$0xff] %v408_v44 }
  0xda   :  { %v300_v45 = vpop.f32.mrf.mxu0  ;;  %v410_v46 = vpop.f32.mrf.mxu1 }
  0xdb   :  { %503 = vst [vmem:[%s1049_s2 + $0x50] sm:$0xff] %v300_v45  ;;  %547 = vst [vmem:[%s1049_s2 + $0x1b0] sm:$0xff] %v410_v46 }
  0xdc   :  { %v302_v47 = vpop.f32.mrf.mxu0  ;;  %v412_v48 = vpop.f32.mrf.mxu1 }
  0xdd   :  { %504 = vst [vmem:[%s1049_s2 + $0x58] sm:$0xff] %v302_v47  ;;  %548 = vst [vmem:[%s1049_s2 + $0x1b8] sm:$0xff] %v412_v48 }
  0xde   :  { %v306_v49 = vpop.f32.mrf.mxu0  ;;  %v416_v50 = vpop.f32.mrf.mxu1 }
  0xdf   :  { %505 = vst [vmem:[%s1049_s2 + $0x60] sm:$0xff] %v306_v49  ;;  %549 = vst [vmem:[%s1049_s2 + $0x1c0] sm:$0xff] %v416_v50 }
  0xe0   :  { %v308_v51 = vpop.f32.mrf.mxu0  ;;  %v418_v52 = vpop.f32.mrf.mxu1 }
  0xe1   :  { %506 = vst [vmem:[%s1049_s2 + $0x68] sm:$0xff] %v308_v51  ;;  %550 = vst [vmem:[%s1049_s2 + $0x1c8] sm:$0xff] %v418_v52 }
  0xe2   :  { %v310_v53 = vpop.f32.mrf.mxu0  ;;  %v420_v54 = vpop.f32.mrf.mxu1 }
  0xe3   :  { %507 = vst [vmem:[%s1049_s2 + $0x70] sm:$0xff] %v310_v53  ;;  %551 = vst [vmem:[%s1049_s2 + $0x1d0] sm:$0xff] %v420_v54 }
  0xe4   :  { %v312_v55 = vpop.f32.mrf.mxu0  ;;  %v422_v56 = vpop.f32.mrf.mxu1 }
  0xe5   :  { %508 = vst [vmem:[%s1049_s2 + $0x78] sm:$0xff] %v312_v55  ;;  %552 = vst [vmem:[%s1049_s2 + $0x1d8] sm:$0xff] %v422_v56 }
  0xe6   :  { %v316_v57 = vpop.f32.mrf.mxu0  ;;  %v426_v58 = vpop.f32.mrf.mxu1 }
  0xe7   :  { %509 = vst [vmem:[%s1049_s2 + $0x80] sm:$0xff] %v316_v57  ;;  %553 = vst [vmem:[%s1049_s2 + $0x1e0] sm:$0xff] %v426_v58 }
  0xe8   :  { %v318_v59 = vpop.f32.mrf.mxu0  ;;  %v428_v60 = vpop.f32.mrf.mxu1 }
  0xe9   :  { %510 = vst [vmem:[%s1049_s2 + $0x88] sm:$0xff] %v318_v59  ;;  %554 = vst [vmem:[%s1049_s2 + $0x1e8] sm:$0xff] %v428_v60 }
  0xea   :  { %v320_v61 = vpop.f32.mrf.mxu0  ;;  %v430_v62 = vpop.f32.mrf.mxu1 }
  0xeb   :  { %511 = vst [vmem:[%s1049_s2 + $0x90] sm:$0xff] %v320_v61  ;;  %555 = vst [vmem:[%s1049_s2 + $0x1f0] sm:$0xff] %v430_v62 }
  0xec   :  { %v322_v63 = vpop.f32.mrf.mxu0  ;;  %v432_v0 = vpop.f32.mrf.mxu1 }
  0xed   :  { %512 = vst [vmem:[%s1049_s2 + $0x98] sm:$0xff] %v322_v63  ;;  %556 = vst [vmem:[%s1049_s2 + $0x1f8] sm:$0xff] %v432_v0 }
  0xee   :  { %v326_v1 = vpop.f32.mrf.mxu0  ;;  %v436_v2 = vpop.f32.mrf.mxu1 }
  0xef   :  { %513 = vst [vmem:[%s1049_s2 + $0xa0] sm:$0xff] %v326_v1  ;;  %557 = vst [vmem:[%s1049_s2 + $0x200] sm:$0xff] %v436_v2 }
  0xf0   :  { %v328_v3 = vpop.f32.mrf.mxu0  ;;  %v438_v4 = vpop.f32.mrf.mxu1 }
  0xf1   :  { %514 = vst [vmem:[%s1049_s2 + $0xa8] sm:$0xff] %v328_v3  ;;  %558 = vst [vmem:[%s1049_s2 + $0x208] sm:$0xff] %v438_v4 }
  0xf2   :  { %v330_v5 = vpop.f32.mrf.mxu0  ;;  %v440_v6 = vpop.f32.mrf.mxu1 }
  0xf3   :  { %515 = vst [vmem:[%s1049_s2 + $0xb0] sm:$0xff] %v330_v5  ;;  %559 = vst [vmem:[%s1049_s2 + $0x210] sm:$0xff] %v440_v6 }
  0xf4   :  { %v332_v7 = vpop.f32.mrf.mxu0  ;;  %v442_v8 = vpop.f32.mrf.mxu1 }
  0xf5   :  { %516 = vst [vmem:[%s1049_s2 + $0xb8] sm:$0xff] %v332_v7  ;;  %560 = vst [vmem:[%s1049_s2 + $0x218] sm:$0xff] %v442_v8 }
  0xf6   :  { %v336_v9 = vpop.f32.mrf.mxu0  ;;  %v446_v10 = vpop.f32.mrf.mxu1 }
  0xf7   :  { %517 = vst [vmem:[%s1049_s2 + $0xc0] sm:$0xff] %v336_v9  ;;  %561 = vst [vmem:[%s1049_s2 + $0x220] sm:$0xff] %v446_v10 }
  0xf8   :  { %v338_v11 = vpop.f32.mrf.mxu0  ;;  %v448_v12 = vpop.f32.mrf.mxu1 }
  0xf9   :  { %518 = vst [vmem:[%s1049_s2 + $0xc8] sm:$0xff] %v338_v11  ;;  %562 = vst [vmem:[%s1049_s2 + $0x228] sm:$0xff] %v448_v12 }
  0xfa   :  { %v340_v13 = vpop.f32.mrf.mxu0  ;;  %v450_v14 = vpop.f32.mrf.mxu1 }
  0xfb   :  { %519 = vst [vmem:[%s1049_s2 + $0xd0] sm:$0xff] %v340_v13  ;;  %563 = vst [vmem:[%s1049_s2 + $0x230] sm:$0xff] %v450_v14 }
  0xfc   :  { %v342_v15 = vpop.f32.mrf.mxu0  ;;  %v452_v16 = vpop.f32.mrf.mxu1 }
  0xfd   :  { %520 = vst [vmem:[%s1049_s2 + $0xd8] sm:$0xff] %v342_v15  ;;  %564 = vst [vmem:[%s1049_s2 + $0x238] sm:$0xff] %v452_v16 }
  0xfe   :  { %v346_v17 = vpop.f32.mrf.mxu0  ;;  %v456_v18 = vpop.f32.mrf.mxu1 }
  0xff   :  { %521 = vst [vmem:[%s1049_s2 + $0xe0] sm:$0xff] %v346_v17  ;;  %565 = vst [vmem:[%s1049_s2 + $0x240] sm:$0xff] %v456_v18 }
 0x100   :  { %v348_v19 = vpop.f32.mrf.mxu0  ;;  %v458_v20 = vpop.f32.mrf.mxu1 }
 0x101   :  { %522 = vst [vmem:[%s1049_s2 + $0xe8] sm:$0xff] %v348_v19  ;;  %566 = vst [vmem:[%s1049_s2 + $0x248] sm:$0xff] %v458_v20 }
 0x102   :  { %v350_v21 = vpop.f32.mrf.mxu0  ;;  %v460_v22 = vpop.f32.mrf.mxu1 }
 0x103   :  { %523 = vst [vmem:[%s1049_s2 + $0xf0] sm:$0xff] %v350_v21  ;;  %567 = vst [vmem:[%s1049_s2 + $0x250] sm:$0xff] %v460_v22 }
 0x104   :  { %v352_v23 = vpop.f32.mrf.mxu0  ;;  %v462_v24 = vpop.f32.mrf.mxu1 }
 0x105   :  { %524 = vst [vmem:[%s1049_s2 + $0xf8] sm:$0xff] %v352_v23  ;;  %568 = vst [vmem:[%s1049_s2 + $0x258] sm:$0xff] %v462_v24 }
 0x106   :  { %v356_v25 = vpop.f32.mrf.mxu0  ;;  %v466_v26 = vpop.f32.mrf.mxu1 }
 0x107   :  { %525 = vst [vmem:[%s1049_s2 + $0x100] sm:$0xff] %v356_v25  ;;  %569 = vst [vmem:[%s1049_s2 + $0x260] sm:$0xff] %v466_v26 }
 0x108   :  { %v358_v27 = vpop.f32.mrf.mxu0  ;;  %v468_v28 = vpop.f32.mrf.mxu1 }
 0x109   :  { %526 = vst [vmem:[%s1049_s2 + $0x108] sm:$0xff] %v358_v27  ;;  %570 = vst [vmem:[%s1049_s2 + $0x268] sm:$0xff] %v468_v28 }
 0x10a   :  { %v360_v29 = vpop.f32.mrf.mxu0  ;;  %v470_v30 = vpop.f32.mrf.mxu1 }
 0x10b   :  { %527 = vst [vmem:[%s1049_s2 + $0x110] sm:$0xff] %v360_v29  ;;  %571 = vst [vmem:[%s1049_s2 + $0x270] sm:$0xff] %v470_v30 }
 0x10c   :  { %v362_v31 = vpop.f32.mrf.mxu0  ;;  %v472_v32 = vpop.f32.mrf.mxu1 }
 0x10d   :  { %528 = vst [vmem:[%s1049_s2 + $0x118] sm:$0xff] %v362_v31  ;;  %572 = vst [vmem:[%s1049_s2 + $0x278] sm:$0xff] %v472_v32 }
 0x10e   :  { %v366_v33 = vpop.f32.mrf.mxu0  ;;  %v476_v34 = vpop.f32.mrf.mxu1 }
 0x10f   :  { %529 = vst [vmem:[%s1049_s2 + $0x120] sm:$0xff] %v366_v33  ;;  %573 = vst [vmem:[%s1049_s2 + $0x280] sm:$0xff] %v476_v34 }
 0x110   :  { %v368_v35 = vpop.f32.mrf.mxu0  ;;  %v478_v36 = vpop.f32.mrf.mxu1 }
 0x111   :  { %530 = vst [vmem:[%s1049_s2 + $0x128] sm:$0xff] %v368_v35  ;;  %574 = vst [vmem:[%s1049_s2 + $0x288] sm:$0xff] %v478_v36 }
 0x112   :  { %v370_v37 = vpop.f32.mrf.mxu0  ;;  %v480_v38 = vpop.f32.mrf.mxu1 }
 0x113   :  { %531 = vst [vmem:[%s1049_s2 + $0x130] sm:$0xff] %v370_v37  ;;  %575 = vst [vmem:[%s1049_s2 + $0x290] sm:$0xff] %v480_v38 }
 0x114   :  { %v372_v39 = vpop.f32.mrf.mxu0  ;;  %v482_v40 = vpop.f32.mrf.mxu1 }
 0x115   :  { %532 = vst [vmem:[%s1049_s2 + $0x138] sm:$0xff] %v372_v39  ;;  %576 = vst [vmem:[%s1049_s2 + $0x298] sm:$0xff] %v482_v40 }
 0x116   :  { %v376_v41 = vpop.f32.mrf.mxu0  ;;  %v486_v42 = vpop.f32.mrf.mxu1 }
 0x117   :  { %533 = vst [vmem:[%s1049_s2 + $0x140] sm:$0xff] %v376_v41  ;;  %577 = vst [vmem:[%s1049_s2 + $0x2a0] sm:$0x3] %v486_v42 }
 0x118   :  { %v378_v43 = vpop.f32.mrf.mxu0  ;;  %v488_v44 = vpop.f32.mrf.mxu1 }
 0x119   :  { %534 = vst [vmem:[%s1049_s2 + $0x148] sm:$0xff] %v378_v43  ;;  %578 = vst [vmem:[%s1049_s2 + $0x2a8] sm:$0x3] %v488_v44 }
 0x11a   :  { %v380_v45 = vpop.f32.mrf.mxu0  ;;  %v490_v46 = vpop.f32.mrf.mxu1 }
 0x11b   :  { %535 = vst [vmem:[%s1049_s2 + $0x150] sm:$0xff] %v380_v45 }
 0x11c   :  { %v382_v47 = vpop.f32.mrf.mxu0  ;;  %v491_v48 = vpop.f32.mrf.mxu1 }
 0x11d   :  { %536 = vst [vmem:[%s1049_s2 + $0x158] sm:$0xff] %v382_v47 }

// kernel: classification_ae_forward.7
= control target key start
LH: loop header
LB: loop body
LE: loop exit
PB: predicated region body
PF: predicated region fallthrough
CT: control target
= control target key end

     0   :  { %vm381_vm0 = vcmask 1043456   ;;  %v1095_v0 = vmov 0.0   ;;  %vm1096_vm1 = vmmov 0   ;;  %vm269_vm2 = vcmask 64512   ;;  %s1630_s1 = inlined_call_operand.vmem [shape: bf16[8,12], index: 1, kind: input, shape index: {}]   ;;  %s1631_s0 = inlined_call_operand.vmem [shape: bf16[578,8], index: 0, kind: input, shape index: {}]   ;;  %s1632_s2 = inlined_call_operand.vmem [shape: f32[578,12], index: 2, kind: output, shape index: {}]  }
   0x1   :  { %904 = vmatprep.subr.bf16.mxu0 %v1095_v0  ;;  %v85_v1 = vld [vmem:[%s1630_s1] sm:$0xf]  ;;  %1054 = vmatprep.subr.bf16.mxu1 %v1095_v0  ;;  %v1059_v4 = vld [vmem:[%s1631_s0 + $0x98] sm:$0xff]   ;;  %v1060_v5 = vld [vmem:[%s1631_s0 + $0x8] sm:$0xff]   ;;  %vm713_vm3 = vcmask 97280   ;;  %vm786_vm4 = vcmask 91136  }
   0x2   :  { %v383_v2 = vsel %vm381_vm0, %v85_v1, 0  ;;  %906 = vmatprep.mubr.msk.bf16.mxu0 %vm1096_vm1, %v1095_v0  ;;  %v1058_v3 = vld [vmem:[%s1631_s0] sm:$0xff]   ;;  %982 = vmatprep.mubr.msk.bf16.mxu1 %vm1096_vm1, %v1095_v0  ;;  %v1062_v7 = vld [vmem:[%s1631_s0 + $0x10] sm:$0xff]   ;;  %v1063_v8 = vld [vmem:[%s1631_s0 + $0xa8] sm:$0xff]  }
   0x3   :  { %905 = vmatpush3.bf16.msra.mxu0 %v383_v2  ;;  %1055 = vmatpush3.bf16.msra.mxu1 %v383_v2  ;;  %v1061_v6 = vld [vmem:[%s1631_s0 + $0xa0] sm:$0xff]   ;;  %v1064_v9 = vld [vmem:[%s1631_s0 + $0x18] sm:$0xff]   ;;  %v1065_v10 = vld [vmem:[%s1631_s0 + $0xb0] sm:$0xff]  }
   0x4   :  { %v1066_v11 = vld [vmem:[%s1631_s0 + $0x20] sm:$0xff]   ;;  %v1067_v12 = vld [vmem:[%s1631_s0 + $0xb8] sm:$0xff]   ;;  %v1068_v13 = vld [vmem:[%s1631_s0 + $0x28] sm:$0xff]  }
   0x5   :  { %v1069_v14 = vld [vmem:[%s1631_s0 + $0xc0] sm:$0xff]   ;;  %v1070_v15 = vld [vmem:[%s1631_s0 + $0x30] sm:$0xff]   ;;  %v1071_v16 = vld [vmem:[%s1631_s0 + $0xc8] sm:$0xff]  }
   0x6   :  { %907 = vmatmul.mubr.msk.bf16.vlgmr.msra.gmra.mxu0 %vm269_vm2, %v1058_v3  ;;  %983 = vmatmul.mubr.msk.bf16.vlgmr.msra.gmra.mxu1 %vm269_vm2, %v1059_v4  ;;  %v1072_v17 = vld [vmem:[%s1631_s0 + $0x38] sm:$0xff]   ;;  %v1073_v18 = vld [vmem:[%s1631_s0 + $0xd0] sm:$0xff]   ;;  %v1074_v19 = vld [vmem:[%s1631_s0 + $0x40] sm:$0xff]  }
   0x7   :  { %910 = vmatprep.mubr.msk.bf16.mxu0 %vm1096_vm1, %v1095_v0  ;;  %986 = vmatprep.mubr.msk.bf16.mxu1 %vm1096_vm1, %v1095_v0  ;;  %v1075_v20 = vld [vmem:[%s1631_s0 + $0xd8] sm:$0xff]   ;;  %v1076_v21 = vld [vmem:[%s1631_s0 + $0x48] sm:$0xff]   ;;  %v1077_v22 = vld [vmem:[%s1631_s0 + $0xe0] sm:$0xff]  }
   0x8   :  { %v1078_v23 = vld [vmem:[%s1631_s0 + $0x50] sm:$0xff]   ;;  %v1079_v24 = vld [vmem:[%s1631_s0 + $0xe8] sm:$0xff]   ;;  %v1080_v25 = vld [vmem:[%s1631_s0 + $0x58] sm:$0xff]  }
   0x9   :  { %v1081_v26 = vld [vmem:[%s1631_s0 + $0xf0] sm:$0xff]   ;;  %v1082_v27 = vld [vmem:[%s1631_s0 + $0x60] sm:$0xff]   ;;  %v1083_v28 = vld [vmem:[%s1631_s0 + $0xf8] sm:$0xff]  }
   0xa   :  { %v1084_v29 = vld [vmem:[%s1631_s0 + $0x68] sm:$0xff]   ;;  %v1085_v30 = vld [vmem:[%s1631_s0 + $0x100] sm:$0xff]   ;;  %v1086_v31 = vld [vmem:[%s1631_s0 + $0x70] sm:$0xff]  }
   0xb   :  { %v1087_v32 = vld [vmem:[%s1631_s0 + $0x108] sm:$0xff]   ;;  %v1088_v33 = vld [vmem:[%s1631_s0 + $0x78] sm:$0xff]   ;;  %v1089_v34 = vld [vmem:[%s1631_s0 + $0x110] sm:$0xff]  }
   0xc   :  { %v1090_v35 = vld [vmem:[%s1631_s0 + $0x80] sm:$0xff]   ;;  %v1091_v36 = vld [vmem:[%s1631_s0 + $0x118] sm:$0xff]   ;;  %v1092_v37 = vld [vmem:[%s1631_s0 + $0x88] sm:$0xff]  }
   0xd   :  { %v1093_v38 = vld [vmem:[%s1631_s0 + $0x120] ss:$0 sps:$4 sm:$0x11]   ;;  %v1094_v39 = vld [vmem:[%s1631_s0 + $0x90] sm:$0xff]  }
   0xe   :  { %911 = vmatmul.mubr.msk.bf16.gmra.mxu0 %vm269_vm2, %v1060_v5  ;;  %987 = vmatmul.mubr.msk.bf16.gmra.mxu1 %vm269_vm2, %v1061_v6 }
   0xf   :  { %914 = vmatprep.mubr.msk.bf16.mxu0 %vm1096_vm1, %v1095_v0  ;;  %990 = vmatprep.mubr.msk.bf16.mxu1 %vm1096_vm1, %v1095_v0 }
  0x16   :  { %915 = vmatmul.mubr.msk.bf16.gmra.mxu0 %vm269_vm2, %v1062_v7  ;;  %991 = vmatmul.mubr.msk.bf16.gmra.mxu1 %vm269_vm2, %v1063_v8 }
  0x17   :  { %918 = vmatprep.mubr.msk.bf16.mxu0 %vm1096_vm1, %v1095_v0  ;;  %994 = vmatprep.mubr.msk.bf16.mxu1 %vm1096_vm1, %v1095_v0 }
  0x1e   :  { %919 = vmatmul.mubr.msk.bf16.gmra.mxu0 %vm269_vm2, %v1064_v9  ;;  %995 = vmatmul.mubr.msk.bf16.gmra.mxu1 %vm269_vm2, %v1065_v10 }
  0x1f   :  { %922 = vmatprep.mubr.msk.bf16.mxu0 %vm1096_vm1, %v1095_v0  ;;  %998 = vmatprep.mubr.msk.bf16.mxu1 %vm1096_vm1, %v1095_v0 }
  0x26   :  { %923 = vmatmul.mubr.msk.bf16.gmra.mxu0 %vm269_vm2, %v1066_v11  ;;  %999 = vmatmul.mubr.msk.bf16.gmra.mxu1 %vm269_vm2, %v1067_v12 }
  0x27   :  { %926 = vmatprep.mubr.msk.bf16.mxu0 %vm1096_vm1, %v1095_v0  ;;  %1002 = vmatprep.mubr.msk.bf16.mxu1 %vm1096_vm1, %v1095_v0 }
  0x2e   :  { %927 = vmatmul.mubr.msk.bf16.gmra.mxu0 %vm269_vm2, %v1068_v13  ;;  %1003 = vmatmul.mubr.msk.bf16.gmra.mxu1 %vm269_vm2, %v1069_v14 }
  0x2f   :  { %930 = vmatprep.mubr.msk.bf16.mxu0 %vm1096_vm1, %v1095_v0  ;;  %1006 = vmatprep.mubr.msk.bf16.mxu1 %vm1096_vm1, %v1095_v0 }
  0x36   :  { %931 = vmatmul.mubr.msk.bf16.gmra.mxu0 %vm269_vm2, %v1070_v15  ;;  %1007 = vmatmul.mubr.msk.bf16.gmra.mxu1 %vm269_vm2, %v1071_v16 }
  0x37   :  { %934 = vmatprep.mubr.msk.bf16.mxu0 %vm1096_vm1, %v1095_v0  ;;  %1010 = vmatprep.mubr.msk.bf16.mxu1 %vm1096_vm1, %v1095_v0 }
  0x3e   :  { %935 = vmatmul.mubr.msk.bf16.gmra.mxu0 %vm269_vm2, %v1072_v17  ;;  %1011 = vmatmul.mubr.msk.bf16.gmra.mxu1 %vm269_vm2, %v1073_v18 }
  0x3f   :  { %938 = vmatprep.mubr.msk.bf16.mxu0 %vm1096_vm1, %v1095_v0  ;;  %1014 = vmatprep.mubr.msk.bf16.mxu1 %vm1096_vm1, %v1095_v0 }
  0x46   :  { %939 = vmatmul.mubr.msk.bf16.gmra.mxu0 %vm269_vm2, %v1074_v19  ;;  %1015 = vmatmul.mubr.msk.bf16.gmra.mxu1 %vm269_vm2, %v1075_v20 }
  0x47   :  { %942 = vmatprep.mubr.msk.bf16.mxu0 %vm1096_vm1, %v1095_v0  ;;  %1018 = vmatprep.mubr.msk.bf16.mxu1 %vm1096_vm1, %v1095_v0 }
  0x4e   :  { %943 = vmatmul.mubr.msk.bf16.gmra.mxu0 %vm269_vm2, %v1076_v21  ;;  %1019 = vmatmul.mubr.msk.bf16.gmra.mxu1 %vm269_vm2, %v1077_v22 }
  0x4f   :  { %946 = vmatprep.mubr.msk.bf16.mxu0 %vm1096_vm1, %v1095_v0  ;;  %1022 = vmatprep.mubr.msk.bf16.mxu1 %vm1096_vm1, %v1095_v0 }
  0x56   :  { %947 = vmatmul.mubr.msk.bf16.gmra.mxu0 %vm269_vm2, %v1078_v23  ;;  %1023 = vmatmul.mubr.msk.bf16.gmra.mxu1 %vm269_vm2, %v1079_v24 }
  0x57   :  { %950 = vmatprep.mubr.msk.bf16.mxu0 %vm1096_vm1, %v1095_v0  ;;  %1026 = vmatprep.mubr.msk.bf16.mxu1 %vm1096_vm1, %v1095_v0 }
  0x5e   :  { %951 = vmatmul.mubr.msk.bf16.gmra.mxu0 %vm269_vm2, %v1080_v25  ;;  %1027 = vmatmul.mubr.msk.bf16.gmra.mxu1 %vm269_vm2, %v1081_v26 }
  0x5f   :  { %954 = vmatprep.mubr.msk.bf16.mxu0 %vm1096_vm1, %v1095_v0  ;;  %1030 = vmatprep.mubr.msk.bf16.mxu1 %vm1096_vm1, %v1095_v0 }
  0x66   :  { %955 = vmatmul.mubr.msk.bf16.gmra.mxu0 %vm269_vm2, %v1082_v27  ;;  %1031 = vmatmul.mubr.msk.bf16.gmra.mxu1 %vm269_vm2, %v1083_v28 }
  0x67   :  { %958 = vmatprep.mubr.msk.bf16.mxu0 %vm1096_vm1, %v1095_v0  ;;  %1034 = vmatprep.mubr.msk.bf16.mxu1 %vm1096_vm1, %v1095_v0 }
  0x6e   :  { %959 = vmatmul.mubr.msk.bf16.gmra.mxu0 %vm269_vm2, %v1084_v29  ;;  %1035 = vmatmul.mubr.msk.bf16.gmra.mxu1 %vm269_vm2, %v1085_v30 }
  0x6f   :  { %962 = vmatprep.mubr.msk.bf16.mxu0 %vm1096_vm1, %v1095_v0  ;;  %1038 = vmatprep.mubr.msk.bf16.mxu1 %vm1096_vm1, %v1095_v0 }
  0x76   :  { %963 = vmatmul.mubr.msk.bf16.gmra.mxu0 %vm269_vm2, %v1086_v31  ;;  %1039 = vmatmul.mubr.msk.bf16.gmra.mxu1 %vm269_vm2, %v1087_v32 }
  0x77   :  { %966 = vmatprep.mubr.msk.bf16.mxu0 %vm1096_vm1, %v1095_v0  ;;  %1042 = vmatprep.mubr.msk.bf16.mxu1 %vm1096_vm1, %v1095_v0 }
  0x7e   :  { %967 = vmatmul.mubr.msk.bf16.gmra.mxu0 %vm269_vm2, %v1088_v33  ;;  %1043 = vmatmul.mubr.msk.bf16.gmra.mxu1 %vm269_vm2, %v1089_v34 }
  0x7f   :  { %970 = vmatprep.mubr.msk.bf16.mxu0 %vm1096_vm1, %v1095_v0  ;;  %1046 = vmatprep.mubr.msk.bf16.mxu1 %vm1096_vm1, %v1095_v0 }
  0x86   :  { %971 = vmatmul.mubr.msk.bf16.gmra.mxu0 %vm269_vm2, %v1090_v35  ;;  %1047 = vmatmul.mubr.msk.bf16.gmra.mxu1 %vm269_vm2, %v1091_v36 }
  0x87   :  { %974 = vmatprep.mubr.msk.bf16.mxu0 %vm1096_vm1, %v1095_v0  ;;  %1050 = vmatprep.mubr.msk.bf16.mxu1 %vm1096_vm1, %v1095_v0 }
  0x8e   :  { %975 = vmatmul.mubr.msk.bf16.gmra.mxu0 %vm269_vm2, %v1092_v37  ;;  %1051 = vmatmul.mubr.msk.bf16.gmra.mxu1 %vm269_vm2, %v1093_v38 }
  0x8f   :  { %978 = vmatprep.mubr.msk.bf16.mxu0 %vm1096_vm1, %v1095_v0 }
  0x96   :  { %979 = vmatmul.mubr.msk.bf16.gmra.mxu0 %vm269_vm2, %v1094_v39 }
  0xc6   :  { %v419_v40 = vpop.f32.mrf.mxu0  ;;  %v571_v41 = vpop.f32.mrf.mxu1 }
  0xc7   :  { %714 = vst.msk [vmem:[%s1632_s2] sm:$0xff] %vm713_vm3, %v419_v40  ;;  %752 = vst.msk [vmem:[%s1632_s2 + $0x130] sm:$0xff] %vm713_vm3, %v571_v41 }
  0xc8   :  { %v908_v42 = vpop.f32.mrf.mxu0  ;;  %v984_v43 = vpop.f32.mrf.mxu1 }
  0xca   :  { %v422_v44 = vpop.f32.mrf.mxu0  ;;  %v574_v45 = vpop.f32.mrf.mxu1 }
  0xcb   :  { %715 = vst.msk [vmem:[%s1632_s2 + $0x8] sm:$0xff] %vm713_vm3, %v422_v44  ;;  %753 = vst.msk [vmem:[%s1632_s2 + $0x138] sm:$0xff] %vm713_vm3, %v574_v45 }
  0xcc   :  { %v909_v46 = vpop.f32.mrf.mxu0  ;;  %v985_v47 = vpop.f32.mrf.mxu1 }
  0xce   :  { %v427_v48 = vpop.f32.mrf.mxu0  ;;  %v579_v49 = vpop.f32.mrf.mxu1 }
  0xcf   :  { %716 = vst.msk [vmem:[%s1632_s2 + $0x10] sm:$0xff] %vm713_vm3, %v427_v48  ;;  %754 = vst.msk [vmem:[%s1632_s2 + $0x140] sm:$0xff] %vm713_vm3, %v579_v49 }
  0xd0   :  { %v912_v50 = vpop.f32.mrf.mxu0  ;;  %v988_v51 = vpop.f32.mrf.mxu1 }
  0xd2   :  { %v430_v52 = vpop.f32.mrf.mxu0  ;;  %v582_v53 = vpop.f32.mrf.mxu1 }
  0xd3   :  { %717 = vst.msk [vmem:[%s1632_s2 + $0x18] sm:$0xff] %vm713_vm3, %v430_v52  ;;  %755 = vst.msk [vmem:[%s1632_s2 + $0x148] sm:$0xff] %vm713_vm3, %v582_v53 }
  0xd4   :  { %v913_v54 = vpop.f32.mrf.mxu0  ;;  %v989_v55 = vpop.f32.mrf.mxu1 }
  0xd6   :  { %v435_v56 = vpop.f32.mrf.mxu0  ;;  %v587_v57 = vpop.f32.mrf.mxu1 }
  0xd7   :  { %718 = vst.msk [vmem:[%s1632_s2 + $0x20] sm:$0xff] %vm713_vm3, %v435_v56  ;;  %756 = vst.msk [vmem:[%s1632_s2 + $0x150] sm:$0xff] %vm713_vm3, %v587_v57 }
  0xd8   :  { %v916_v58 = vpop.f32.mrf.mxu0  ;;  %v992_v59 = vpop.f32.mrf.mxu1 }
  0xda   :  { %v438_v60 = vpop.f32.mrf.mxu0  ;;  %v590_v61 = vpop.f32.mrf.mxu1 }
  0xdb   :  { %719 = vst.msk [vmem:[%s1632_s2 + $0x28] sm:$0xff] %vm713_vm3, %v438_v60  ;;  %757 = vst.msk [vmem:[%s1632_s2 + $0x158] sm:$0xff] %vm713_vm3, %v590_v61 }
  0xdc   :  { %v917_v62 = vpop.f32.mrf.mxu0  ;;  %v993_v63 = vpop.f32.mrf.mxu1 }
  0xde   :  { %v443_v0 = vpop.f32.mrf.mxu0  ;;  %v595_v1 = vpop.f32.mrf.mxu1 }
  0xdf   :  { %720 = vst.msk [vmem:[%s1632_s2 + $0x30] sm:$0xff] %vm713_vm3, %v443_v0  ;;  %758 = vst.msk [vmem:[%s1632_s2 + $0x160] sm:$0xff] %vm713_vm3, %v595_v1 }
  0xe0   :  { %v920_v2 = vpop.f32.mrf.mxu0  ;;  %v996_v3 = vpop.f32.mrf.mxu1 }
  0xe2   :  { %v446_v4 = vpop.f32.mrf.mxu0  ;;  %v598_v5 = vpop.f32.mrf.mxu1 }
  0xe3   :  { %721 = vst.msk [vmem:[%s1632_s2 + $0x38] sm:$0xff] %vm713_vm3, %v446_v4  ;;  %759 = vst.msk [vmem:[%s1632_s2 + $0x168] sm:$0xff] %vm713_vm3, %v598_v5 }
  0xe4   :  { %v921_v6 = vpop.f32.mrf.mxu0  ;;  %v997_v7 = vpop.f32.mrf.mxu1 }
  0xe6   :  { %v451_v8 = vpop.f32.mrf.mxu0  ;;  %v603_v9 = vpop.f32.mrf.mxu1 }
  0xe7   :  { %722 = vst.msk [vmem:[%s1632_s2 + $0x40] sm:$0xff] %vm713_vm3, %v451_v8  ;;  %760 = vst.msk [vmem:[%s1632_s2 + $0x170] sm:$0xff] %vm713_vm3, %v603_v9 }
  0xe8   :  { %v924_v10 = vpop.f32.mrf.mxu0  ;;  %v1000_v11 = vpop.f32.mrf.mxu1 }
  0xea   :  { %v454_v12 = vpop.f32.mrf.mxu0  ;;  %v606_v13 = vpop.f32.mrf.mxu1 }
  0xeb   :  { %723 = vst.msk [vmem:[%s1632_s2 + $0x48] sm:$0xff] %vm713_vm3, %v454_v12  ;;  %761 = vst.msk [vmem:[%s1632_s2 + $0x178] sm:$0xff] %vm713_vm3, %v606_v13 }
  0xec   :  { %v925_v14 = vpop.f32.mrf.mxu0  ;;  %v1001_v15 = vpop.f32.mrf.mxu1 }
  0xee   :  { %v459_v16 = vpop.f32.mrf.mxu0  ;;  %v611_v17 = vpop.f32.mrf.mxu1 }
  0xef   :  { %724 = vst.msk [vmem:[%s1632_s2 + $0x50] sm:$0xff] %vm713_vm3, %v459_v16  ;;  %762 = vst.msk [vmem:[%s1632_s2 + $0x180] sm:$0xff] %vm713_vm3, %v611_v17 }
  0xf0   :  { %v928_v18 = vpop.f32.mrf.mxu0  ;;  %v1004_v19 = vpop.f32.mrf.mxu1 }
  0xf2   :  { %v462_v20 = vpop.f32.mrf.mxu0  ;;  %v614_v21 = vpop.f32.mrf.mxu1 }
  0xf3   :  { %725 = vst.msk [vmem:[%s1632_s2 + $0x58] sm:$0xff] %vm713_vm3, %v462_v20  ;;  %763 = vst.msk [vmem:[%s1632_s2 + $0x188] sm:$0xff] %vm713_vm3, %v614_v21 }
  0xf4   :  { %v929_v22 = vpop.f32.mrf.mxu0  ;;  %v1005_v23 = vpop.f32.mrf.mxu1 }
  0xf6   :  { %v467_v24 = vpop.f32.mrf.mxu0  ;;  %v619_v25 = vpop.f32.mrf.mxu1 }
  0xf7   :  { %726 = vst.msk [vmem:[%s1632_s2 + $0x60] sm:$0xff] %vm713_vm3, %v467_v24  ;;  %764 = vst.msk [vmem:[%s1632_s2 + $0x190] sm:$0xff] %vm713_vm3, %v619_v25 }
  0xf8   :  { %v932_v26 = vpop.f32.mrf.mxu0  ;;  %v1008_v27 = vpop.f32.mrf.mxu1 }
  0xfa   :  { %v470_v28 = vpop.f32.mrf.mxu0  ;;  %v622_v29 = vpop.f32.mrf.mxu1 }
  0xfb   :  { %727 = vst.msk [vmem:[%s1632_s2 + $0x68] sm:$0xff] %vm713_vm3, %v470_v28  ;;  %765 = vst.msk [vmem:[%s1632_s2 + $0x198] sm:$0xff] %vm713_vm3, %v622_v29 }
  0xfc   :  { %v933_v30 = vpop.f32.mrf.mxu0  ;;  %v1009_v31 = vpop.f32.mrf.mxu1 }
  0xfe   :  { %v475_v32 = vpop.f32.mrf.mxu0  ;;  %v627_v33 = vpop.f32.mrf.mxu1 }
  0xff   :  { %728 = vst.msk [vmem:[%s1632_s2 + $0x70] sm:$0xff] %vm713_vm3, %v475_v32  ;;  %766 = vst.msk [vmem:[%s1632_s2 + $0x1a0] sm:$0xff] %vm713_vm3, %v627_v33 }
 0x100   :  { %v936_v34 = vpop.f32.mrf.mxu0  ;;  %v1012_v35 = vpop.f32.mrf.mxu1 }
 0x102   :  { %v478_v36 = vpop.f32.mrf.mxu0  ;;  %v630_v37 = vpop.f32.mrf.mxu1 }
 0x103   :  { %729 = vst.msk [vmem:[%s1632_s2 + $0x78] sm:$0xff] %vm713_vm3, %v478_v36  ;;  %767 = vst.msk [vmem:[%s1632_s2 + $0x1a8] sm:$0xff] %vm713_vm3, %v630_v37 }
 0x104   :  { %v937_v38 = vpop.f32.mrf.mxu0  ;;  %v1013_v39 = vpop.f32.mrf.mxu1 }
 0x106   :  { %v483_v40 = vpop.f32.mrf.mxu0  ;;  %v635_v41 = vpop.f32.mrf.mxu1 }
 0x107   :  { %730 = vst.msk [vmem:[%s1632_s2 + $0x80] sm:$0xff] %vm713_vm3, %v483_v40  ;;  %768 = vst.msk [vmem:[%s1632_s2 + $0x1b0] sm:$0xff] %vm713_vm3, %v635_v41 }
 0x108   :  { %v940_v42 = vpop.f32.mrf.mxu0  ;;  %v1016_v43 = vpop.f32.mrf.mxu1 }
 0x10a   :  { %v486_v44 = vpop.f32.mrf.mxu0  ;;  %v638_v45 = vpop.f32.mrf.mxu1 }
 0x10b   :  { %731 = vst.msk [vmem:[%s1632_s2 + $0x88] sm:$0xff] %vm713_vm3, %v486_v44  ;;  %769 = vst.msk [vmem:[%s1632_s2 + $0x1b8] sm:$0xff] %vm713_vm3, %v638_v45 }
 0x10c   :  { %v941_v46 = vpop.f32.mrf.mxu0  ;;  %v1017_v47 = vpop.f32.mrf.mxu1 }
 0x10e   :  { %v491_v48 = vpop.f32.mrf.mxu0  ;;  %v643_v49 = vpop.f32.mrf.mxu1 }
 0x10f   :  { %732 = vst.msk [vmem:[%s1632_s2 + $0x90] sm:$0xff] %vm713_vm3, %v491_v48  ;;  %770 = vst.msk [vmem:[%s1632_s2 + $0x1c0] sm:$0xff] %vm713_vm3, %v643_v49 }
 0x110   :  { %v944_v50 = vpop.f32.mrf.mxu0  ;;  %v1020_v51 = vpop.f32.mrf.mxu1 }
 0x112   :  { %v494_v52 = vpop.f32.mrf.mxu0  ;;  %v646_v53 = vpop.f32.mrf.mxu1 }
 0x113   :  { %733 = vst.msk [vmem:[%s1632_s2 + $0x98] sm:$0xff] %vm713_vm3, %v494_v52  ;;  %771 = vst.msk [vmem:[%s1632_s2 + $0x1c8] sm:$0xff] %vm713_vm3, %v646_v53 }
 0x114   :  { %v945_v54 = vpop.f32.mrf.mxu0  ;;  %v1021_v55 = vpop.f32.mrf.mxu1 }
 0x116   :  { %v499_v56 = vpop.f32.mrf.mxu0  ;;  %v651_v57 = vpop.f32.mrf.mxu1 }
 0x117   :  { %734 = vst.msk [vmem:[%s1632_s2 + $0xa0] sm:$0xff] %vm713_vm3, %v499_v56  ;;  %772 = vst.msk [vmem:[%s1632_s2 + $0x1d0] sm:$0xff] %vm713_vm3, %v651_v57 }
 0x118   :  { %v948_v58 = vpop.f32.mrf.mxu0  ;;  %v1024_v59 = vpop.f32.mrf.mxu1 }
 0x11a   :  { %v502_v60 = vpop.f32.mrf.mxu0  ;;  %v654_v61 = vpop.f32.mrf.mxu1 }
 0x11b   :  { %735 = vst.msk [vmem:[%s1632_s2 + $0xa8] sm:$0xff] %vm713_vm3, %v502_v60  ;;  %773 = vst.msk [vmem:[%s1632_s2 + $0x1d8] sm:$0xff] %vm713_vm3, %v654_v61 }
 0x11c   :  { %v949_v62 = vpop.f32.mrf.mxu0  ;;  %v1025_v63 = vpop.f32.mrf.mxu1 }
 0x11e   :  { %v507_v0 = vpop.f32.mrf.mxu0  ;;  %v659_v1 = vpop.f32.mrf.mxu1 }
 0x11f   :  { %736 = vst.msk [vmem:[%s1632_s2 + $0xb0] sm:$0xff] %vm713_vm3, %v507_v0  ;;  %774 = vst.msk [vmem:[%s1632_s2 + $0x1e0] sm:$0xff] %vm713_vm3, %v659_v1 }
 0x120   :  { %v952_v2 = vpop.f32.mrf.mxu0  ;;  %v1028_v3 = vpop.f32.mrf.mxu1 }
 0x122   :  { %v510_v4 = vpop.f32.mrf.mxu0  ;;  %v662_v5 = vpop.f32.mrf.mxu1 }
 0x123   :  { %737 = vst.msk [vmem:[%s1632_s2 + $0xb8] sm:$0xff] %vm713_vm3, %v510_v4  ;;  %775 = vst.msk [vmem:[%s1632_s2 + $0x1e8] sm:$0xff] %vm713_vm3, %v662_v5 }
 0x124   :  { %v953_v6 = vpop.f32.mrf.mxu0  ;;  %v1029_v7 = vpop.f32.mrf.mxu1 }
 0x126   :  { %v515_v8 = vpop.f32.mrf.mxu0  ;;  %v667_v9 = vpop.f32.mrf.mxu1 }
 0x127   :  { %738 = vst.msk [vmem:[%s1632_s2 + $0xc0] sm:$0xff] %vm713_vm3, %v515_v8  ;;  %776 = vst.msk [vmem:[%s1632_s2 + $0x1f0] sm:$0xff] %vm713_vm3, %v667_v9 }
 0x128   :  { %v956_v10 = vpop.f32.mrf.mxu0  ;;  %v1032_v11 = vpop.f32.mrf.mxu1 }
 0x12a   :  { %v518_v12 = vpop.f32.mrf.mxu0  ;;  %v670_v13 = vpop.f32.mrf.mxu1 }
 0x12b   :  { %739 = vst.msk [vmem:[%s1632_s2 + $0xc8] sm:$0xff] %vm713_vm3, %v518_v12  ;;  %777 = vst.msk [vmem:[%s1632_s2 + $0x1f8] sm:$0xff] %vm713_vm3, %v670_v13 }
 0x12c   :  { %v957_v14 = vpop.f32.mrf.mxu0  ;;  %v1033_v15 = vpop.f32.mrf.mxu1 }
 0x12e   :  { %v523_v16 = vpop.f32.mrf.mxu0  ;;  %v675_v17 = vpop.f32.mrf.mxu1 }
 0x12f   :  { %740 = vst.msk [vmem:[%s1632_s2 + $0xd0] sm:$0xff] %vm713_vm3, %v523_v16  ;;  %778 = vst.msk [vmem:[%s1632_s2 + $0x200] sm:$0xff] %vm713_vm3, %v675_v17 }
 0x130   :  { %v960_v18 = vpop.f32.mrf.mxu0  ;;  %v1036_v19 = vpop.f32.mrf.mxu1 }
 0x132   :  { %v526_v20 = vpop.f32.mrf.mxu0  ;;  %v678_v21 = vpop.f32.mrf.mxu1 }
 0x133   :  { %741 = vst.msk [vmem:[%s1632_s2 + $0xd8] sm:$0xff] %vm713_vm3, %v526_v20  ;;  %779 = vst.msk [vmem:[%s1632_s2 + $0x208] sm:$0xff] %vm713_vm3, %v678_v21 }
 0x134   :  { %v961_v22 = vpop.f32.mrf.mxu0  ;;  %v1037_v23 = vpop.f32.mrf.mxu1 }
 0x136   :  { %v531_v24 = vpop.f32.mrf.mxu0  ;;  %v683_v25 = vpop.f32.mrf.mxu1 }
 0x137   :  { %742 = vst.msk [vmem:[%s1632_s2 + $0xe0] sm:$0xff] %vm713_vm3, %v531_v24  ;;  %780 = vst.msk [vmem:[%s1632_s2 + $0x210] sm:$0xff] %vm713_vm3, %v683_v25 }
 0x138   :  { %v964_v26 = vpop.f32.mrf.mxu0  ;;  %v1040_v27 = vpop.f32.mrf.mxu1 }
 0x13a   :  { %v534_v28 = vpop.f32.mrf.mxu0  ;;  %v686_v29 = vpop.f32.mrf.mxu1 }
 0x13b   :  { %743 = vst.msk [vmem:[%s1632_s2 + $0xe8] sm:$0xff] %vm713_vm3, %v534_v28  ;;  %781 = vst.msk [vmem:[%s1632_s2 + $0x218] sm:$0xff] %vm713_vm3, %v686_v29 }
 0x13c   :  { %v965_v30 = vpop.f32.mrf.mxu0  ;;  %v1041_v31 = vpop.f32.mrf.mxu1 }
 0x13e   :  { %v539_v32 = vpop.f32.mrf.mxu0  ;;  %v691_v33 = vpop.f32.mrf.mxu1 }
 0x13f   :  { %744 = vst.msk [vmem:[%s1632_s2 + $0xf0] sm:$0xff] %vm713_vm3, %v539_v32  ;;  %782 = vst.msk [vmem:[%s1632_s2 + $0x220] sm:$0xff] %vm713_vm3, %v691_v33 }
 0x140   :  { %v968_v34 = vpop.f32.mrf.mxu0  ;;  %v1044_v35 = vpop.f32.mrf.mxu1 }
 0x142   :  { %v542_v36 = vpop.f32.mrf.mxu0  ;;  %v694_v37 = vpop.f32.mrf.mxu1 }
 0x143   :  { %745 = vst.msk [vmem:[%s1632_s2 + $0xf8] sm:$0xff] %vm713_vm3, %v542_v36  ;;  %783 = vst.msk [vmem:[%s1632_s2 + $0x228] sm:$0xff] %vm713_vm3, %v694_v37 }
 0x144   :  { %v969_v38 = vpop.f32.mrf.mxu0  ;;  %v1045_v39 = vpop.f32.mrf.mxu1 }
 0x146   :  { %v547_v40 = vpop.f32.mrf.mxu0  ;;  %v699_v41 = vpop.f32.mrf.mxu1 }
 0x147   :  { %746 = vst.msk [vmem:[%s1632_s2 + $0x100] sm:$0xff] %vm713_vm3, %v547_v40  ;;  %784 = vst.msk [vmem:[%s1632_s2 + $0x230] sm:$0xff] %vm713_vm3, %v699_v41 }
 0x148   :  { %v972_v42 = vpop.f32.mrf.mxu0  ;;  %v1048_v43 = vpop.f32.mrf.mxu1 }
 0x14a   :  { %v550_v44 = vpop.f32.mrf.mxu0  ;;  %v702_v45 = vpop.f32.mrf.mxu1 }
 0x14b   :  { %747 = vst.msk [vmem:[%s1632_s2 + $0x108] sm:$0xff] %vm713_vm3, %v550_v44  ;;  %785 = vst.msk [vmem:[%s1632_s2 + $0x238] sm:$0xff] %vm713_vm3, %v702_v45 }
 0x14c   :  { %v973_v46 = vpop.f32.mrf.mxu0  ;;  %v1049_v47 = vpop.f32.mrf.mxu1 }
 0x14e   :  { %v555_v48 = vpop.f32.mrf.mxu0  ;;  %v707_v49 = vpop.f32.mrf.mxu1 }
 0x14f   :  { %748 = vst.msk [vmem:[%s1632_s2 + $0x110] sm:$0xff] %vm713_vm3, %v555_v48 }
 0x150   :  { %787 = vst.msk [vmem:[%s1632_s2 + $0x240] sm:$0x3] %vm786_vm4, %v707_v49  ;;  %v976_v50 = vpop.f32.mrf.mxu0  ;;  %v1052_v51 = vpop.f32.mrf.mxu1 }
 0x152   :  { %v558_v52 = vpop.f32.mrf.mxu0  ;;  %v710_v53 = vpop.f32.mrf.mxu1 }
 0x153   :  { %749 = vst.msk [vmem:[%s1632_s2 + $0x118] sm:$0xff] %vm713_vm3, %v558_v52 }
 0x154   :  { %v977_v54 = vpop.f32.mrf.mxu0  ;;  %v1053_v55 = vpop.f32.mrf.mxu1 }
 0x156   :  { %v563_v56 = vpop.f32.mrf.mxu0 }
 0x157   :  { %750 = vst.msk [vmem:[%s1632_s2 + $0x120] sm:$0xff] %vm713_vm3, %v563_v56 }
 0x158   :  { %v980_v57 = vpop.f32.mrf.mxu0 }
 0x15a   :  { %v566_v58 = vpop.f32.mrf.mxu0 }
 0x15b   :  { %751 = vst.msk [vmem:[%s1632_s2 + $0x128] sm:$0xff] %vm713_vm3, %v566_v58 }
 0x15c   :  { %v981_v59 = vpop.f32.mrf.mxu0 }

</bundles_post_ra>
